<compile_context>
chip_gen: v7x
topology: tpu7x:2x2x1
jax: 0.10.0
libtpu: 0.0.40
codegen_flags: <defaults>
</compile_context>

<pallas_src>
import functools

import jax
import jax.numpy as jnp
from jax.experimental import pallas as pl
from jax.experimental.pallas import tpu as pltpu


def se_gate_mul_kernel(x_ref, w_ref, b_ref, feat_ref, o_ref):
    # x_ref:    (Cin, 1)      -- squeeze vector column (bf16)
    # w_ref:    (TC, Cin)     -- 1x1-conv weight tile, native (Cout, Cin) order (bf16)
    # b_ref:    (TC, 1)       -- bias column tile (f32)
    # feat_ref: (TC, HW)      -- feature map tile, native (Cout, HW) layout
    # o_ref:    (TC, HW)
    # 1x1 conv on a 1x1 spatial input == matvec: (TC,Cin)@(Cin,1) -> (TC,1) on the MXU.
    gate = jnp.dot(w_ref[...], x_ref[...],
                   preferred_element_type=jnp.float32) + b_ref[...]
    gate = jax.nn.sigmoid(gate)                       # (TC, 1) f32, EUP transcendental
    # Broadcast along the lane (HW) axis; mixed dtype promotes to f32, then downcast.
    o_ref[...] = (gate * feat_ref[...]).astype(o_ref.dtype)


def prepare_params(weight, bias):
    """One-time (static-weight) param prep: no transposes, bf16 weight, bias column."""
    cout, cin = weight.shape[0], weight.shape[1]
    w2d = weight.reshape(cout, cin).astype(jnp.bfloat16)   # (Cout, Cin), native order
    b_col = bias.reshape(cout, 1).astype(jnp.float32)      # (Cout, 1)
    return w2d, b_col


def se_conv_sigmoid_mul(x484, x481, w2d, b_col, *, tile_c=768):
    """x484: [1, Cin, 1, 1], x481: [1, Cout, H, W],
    w2d: [Cout, Cin] (bf16), b_col: [Cout, 1] (f32)."""
    n, cin, _, _ = x484.shape
    _, cout, h, w = x481.shape
    hw = h * w
    assert n == 1
    assert cout % tile_c == 0 and tile_c % 8 == 0

    out_dtype = x481.dtype
    out_itemsize = jnp.dtype(out_dtype).itemsize

    x_col = x484.reshape(cin, 1).astype(w2d.dtype)   # (Cin, 1), tiny
    feat = x481.reshape(cout, hw)                    # (Cout, HW): metadata-only reshape

    grid = (cout // tile_c,)

    cost = pl.CostEstimate(
        flops=2 * cout * cin,
        transcendentals=cout,
        bytes_accessed=(feat.size * feat.dtype.itemsize
                        + w2d.size * w2d.dtype.itemsize
                        + b_col.size * b_col.dtype.itemsize
                        + x_col.size * x_col.dtype.itemsize
                        + cout * hw * out_itemsize),
    )

    out = pl.pallas_call(
        se_gate_mul_kernel,
        out_shape=jax.ShapeDtypeStruct((cout, hw), out_dtype),
        grid_spec=pltpu.PrefetchScalarGridSpec(
            num_scalar_prefetch=0,
            grid=grid,
            in_specs=[
                pl.BlockSpec((cin, 1), lambda i: (0, 0)),        # squeeze vector (shared)
                pl.BlockSpec((tile_c, cin), lambda i: (i, 0)),   # weight tile (TC, Cin)
                pl.BlockSpec((tile_c, 1), lambda i: (i, 0)),     # bias column tile
                pl.BlockSpec((tile_c, hw), lambda i: (i, 0)),    # feature tile (TC, HW)
            ],
            out_specs=pl.BlockSpec((tile_c, hw), lambda i: (i, 0)),
        ),
        compiler_params=pltpu.CompilerParams(
            dimension_semantics=("parallel",)),
        cost_estimate=cost,
    )(x_col, w2d, b_col, feat)

    # Back to NCHW: metadata-only reshape, no transpose.
    return out.reshape(1, cout, h, w)


if __name__ == "__main__":
    key = jax.random.PRNGKey(0)
    k1, k2, k3, k4 = jax.random.split(key, 4)

    CIN, COUT, H, W = 64, 1536, 7, 7

    # Deterministic example inputs (matching the module's forward signature).
    x484 = jax.random.normal(k1, (1, CIN, 1, 1), dtype=jnp.float32)     # squeeze vector
    x481 = jax.random.normal(k2, (1, COUT, H, W), dtype=jnp.float32)    # feature map

    # Deterministic conv parameters (Conv2d(64, 1536, kernel_size=1)).
    fan_in = CIN  # 1x1 kernel
    bound = 1.0 / jnp.sqrt(fan_in)
    weight = jax.random.uniform(k3, (COUT, CIN, 1, 1), dtype=jnp.float32,
                                minval=-bound, maxval=bound)
    bias = jax.random.uniform(k4, (COUT,), dtype=jnp.float32,
                              minval=-bound, maxval=bound)

    # Static-weight prep done once, outside the hot path.
    w2d, b_col = prepare_params(weight, bias)

    se_forward = jax.jit(functools.partial(se_conv_sigmoid_mul, tile_c=768))
    out = se_forward(x484, x481, w2d, b_col)
    out = jax.block_until_ready(out)

    # Reference check in plain JAX (module semantics, f32).
    gate_ref = jax.nn.sigmoid(
        jnp.einsum('oi,i->o', weight.reshape(COUT, CIN), x484.reshape(CIN)) + bias)
    ref = gate_ref.reshape(1, COUT, 1, 1) * x481
    assert out.shape == (1, COUT, H, W)
    # bf16 weights in the SE gate -> slightly looser tolerance than pure f32.
    assert jnp.allclose(out, ref, atol=1e-2, rtol=1e-2)

    print("KERNEL_OK")
</pallas_src>

<mosaic_0001>
module attributes {stable_mosaic.version = 11 : i64} {
  func.func @se_gate_mul_kernel(%arg0: i32, %arg1: memref<64x1xbf16, #tpu.memory_space<vmem>>, %arg2: memref<768x64xbf16, #tpu.memory_space<vmem>>, %arg3: memref<768x1xf32, #tpu.memory_space<vmem>>, %arg4: memref<768x49xf32, #tpu.memory_space<vmem>>, %arg5: memref<768x49xf32, #tpu.memory_space<vmem>>) attributes {dimension_semantics = [#tpu.dimension_semantics<parallel>], iteration_bounds = array<i64: 2>, scalar_prefetch = 0 : i64, scratch_operands = 0 : i64, tpu.core_type = #tpu.core_type<tc>, window_params = [{pipeline_mode = #tpu.pipeline_mode<synchronous>, transform_indices = @transform_0, window_bounds = array<i64: 64, 1>}, {transform_indices = @transform_1, window_bounds = array<i64: 768, 64>}, {transform_indices = @transform_2, window_bounds = array<i64: 768, 1>}, {transform_indices = @transform_3, window_bounds = array<i64: 768, 49>}, {transform_indices = @transform_4, window_bounds = array<i64: 768, 49>}]} {
    %c0 = arith.constant 0 : index
    %c0_0 = arith.constant 0 : index
    %0 = vector.load %arg2[%c0, %c0_0] : memref<768x64xbf16, #tpu.memory_space<vmem>>, vector<768x64xbf16>
    %c0_1 = arith.constant 0 : index
    %c0_2 = arith.constant 0 : index
    %1 = vector.load %arg1[%c0_1, %c0_2] : memref<64x1xbf16, #tpu.memory_space<vmem>>, vector<64x1xbf16>
    %cst = arith.constant dense<0.000000e+00> : vector<768x1xf32>
    %2 = tpu.matmul %0, %1, %cst {dimension_numbers = #tpu.dot_dimension_numbers<[1], [0], [0], [1], [0, 0, 1, 1], [], []>} : vector<768x64xbf16>, vector<64x1xbf16>, vector<768x1xf32> -> vector<768x1xf32>
    %c0_3 = arith.constant 0 : index
    %c0_4 = arith.constant 0 : index
    %3 = vector.load %arg3[%c0_3, %c0_4] : memref<768x1xf32, #tpu.memory_space<vmem>>, vector<768x1xf32>
    %4 = arith.addf %2, %3 : vector<768x1xf32>
    %5 = arith.negf %4 : vector<768x1xf32>
    %6 = math.exp %5 : vector<768x1xf32>
    %cst_5 = arith.constant 1.000000e+00 : f32
    %7 = vector.broadcast %cst_5 : f32 to vector<768x1xf32>
    %8 = arith.addf %7, %6 : vector<768x1xf32>
    %9 = arith.divf %7, %8 : vector<768x1xf32>
    %c0_6 = arith.constant 0 : index
    %c0_7 = arith.constant 0 : index
    %10 = vector.load %arg4[%c0_6, %c0_7] : memref<768x49xf32, #tpu.memory_space<vmem>>, vector<768x49xf32>
    %11 = vector.broadcast %9 : vector<768x1xf32> to vector<768x49xf32>
    %12 = arith.mulf %11, %10 : vector<768x49xf32>
    %c0_8 = arith.constant 0 : index
    %c0_9 = arith.constant 0 : index
    %13 = vector.load %arg5[%c0_8, %c0_9] : memref<768x49xf32, #tpu.memory_space<vmem>>, vector<768x49xf32>
    tpu.vector_store %arg5[%c0_8, %c0_9], %12 {strides = array<i32>} : memref<768x49xf32, #tpu.memory_space<vmem>>, vector<768x49xf32>,
    return
  }
  func.func @transform_0(%arg0: i32) -> (i32, i32) {
    %c0_i32 = arith.constant 0 : i32
    %c0_i32_0 = arith.constant 0 : i32
    %c0_i32_1 = arith.constant 0 : i32
    return %c0_i32, %c0_i32_0 : i32, i32
  }
  func.func @transform_1(%arg0: i32) -> (i32, i32) {
    %c0_i32 = arith.constant 0 : i32
    %c0_i32_0 = arith.constant 0 : i32
    return %arg0, %c0_i32 : i32, i32
  }
  func.func @transform_2(%arg0: i32) -> (i32, i32) {
    %c0_i32 = arith.constant 0 : i32
    %c0_i32_0 = arith.constant 0 : i32
    return %arg0, %c0_i32 : i32, i32
  }
  func.func @transform_3(%arg0: i32) -> (i32, i32) {
    %c0_i32 = arith.constant 0 : i32
    %c0_i32_0 = arith.constant 0 : i32
    return %arg0, %c0_i32 : i32, i32
  }
  func.func @transform_4(%arg0: i32) -> (i32, i32) {
    %c0_i32 = arith.constant 0 : i32
    %c0_i32_0 = arith.constant 0 : i32
    return %arg0, %c0_i32 : i32, i32
  }
}

</mosaic_0001>

<bundles_post_ra>
// kernel: se_conv_sigmoid_mul.1
= control target key start
LH: loop header
LB: loop body
LE: loop exit
PB: predicated region body
PF: predicated region fallthrough
CT: control target
= control target key end

     0   :  { %s3549_s15 = smov 0   ;;  %s4315_s0 = inlined_call_operand.vmem [shape: bf16[64,1], index: 0, kind: input, shape index: {}]   ;;  %s4316_s1 = inlined_call_operand.vmem [shape: bf16[1536,64], index: 1, kind: input, shape index: {}]   ;;  %s4317_s2 = inlined_call_operand.vmem [shape: f32[1536,1], index: 2, kind: input, shape index: {}]   ;;  %s4318_s3 = inlined_call_operand.vmem [shape: f32[1536,49], index: 3, kind: input, shape index: {}]   ;;  %s4319_s4 = inlined_call_operand.vmem [shape: f32[1536,49], index: 4, kind: output, shape index: {}]  }
   0x1 LB: > { %s2697_s16 = sadd.s32 4294967295, %s3521_s15   ;;  %p2701_p0 = scmp.ge.s32.totalorder %s3521_s15, 1  ;;  %s3521_s15 = sphi %s3549_s15, %s14_s15  }
   0x2   : > { %p185_p1 = scmp.lt.s32.totalorder %s3521_s15, 3 }
   0x4   : > { %p186_p2 = pnand %p2701_p0, %p185_p1 }
   0x6   : > { %189 = sbr.rel (%p186_p2) target bundleno = 599 (0x257), region = 36 }
   0xd   : > { %v3079_v0 = vld [vmem:[%s4315_s0] sm:$0xff]   ;;  %s221_s19 = smul.u32 96, %s2697_s16  ;;  %v3080_v1 = vld [vmem:[%s4315_s0 + $0x8] sm:$0xff]   ;;  %v3081_v2 = vld [vmem:[%s4315_s0 + $0x10] sm:$0xff]   ;;  %vm710_vm0 = vcmask 523264   ;;  %v3523_v52 = vmov 0  }
   0xe   : > { %2956 = vmatprep.subr.bf16.mxu0 %v3079_v0  ;;  %3060 = vmatprep.subr.bf16.mxu1 %v3079_v0  ;;  %v3082_v3 = vld [vmem:[%s4315_s0 + $0x18] sm:$0xff]   ;;  %vm2520_vm1 = vcmask 400384  }
   0xf   : > { %p222_p3 = scmp.lt.s32.totalorder %s221_s19, 191  ;;  %2957 = vmatpush3.bf16.msra.mxu0 %v3079_v0  ;;  %3064 = vmatpush3.bf16.msra.mxu1 %v3079_v0 }
  0x10   : > { %2958 = vmatprep.subr.bf16.mxu0 %v3080_v1  ;;  %3061 = vmatprep.subr.bf16.mxu1 %v3080_v1 }
  0x11   : > { %s4331_s19 = smov (!%p222_p3, %s221_s19), 191  ;;  %3078 = vset.pattern.permute.xlu0 %v3523_v52  ;;  %3077 = vset.pattern.permute.xlu1 %v3523_v52 }
  0x12   : > { %s2702_s24 = sshll.u32 %s4331_s19, 2  ;;  %s3674_s30 = sshll.u32 %s4331_s19, 3 }
  0x13   : > { %2959 = vmatpush3.bf16.msra.mxu0 %v3080_v1  ;;  %3065 = vmatpush3.bf16.msra.mxu1 %v3080_v1  ;;  %s3575_s29 = scalar_lea.vmem %s4316_s1, %s2702_s24  ;;  %s3680_s7 = scalar_lea.vmem %s4317_s2, %s3674_s30 }
  0x14   : > { %2960 = vmatprep.subr.bf16.mxu0 %v3081_v2  ;;  %3062 = vmatprep.subr.bf16.mxu1 %v3081_v2  ;;  %v3083_v4 = vld [vmem:[%s3575_s29] sm:$0xff]   ;;  %v3085_v6 = vld [vmem:[%s3575_s29 + $0x8] sm:$0xff]   ;;  %v3087_v8 = vld [vmem:[%s3575_s29 + $0x10] sm:$0xff]   ;;  %s3981_s10 = scalar_lea.vmem %s4318_s3, %s3674_s30  ;;  %s3993_s13 = scalar_lea.vmem %s4319_s4, %s3674_s30 }
  0x15   : > { %v3084_v5 = vld [vmem:[%s3575_s29 + $0xc0] sm:$0xff]   ;;  %2964 = vmatprep.mubr.msk.bf16.mxu0 %vm710_vm0, %v3083_v4  ;;  %v3086_v7 = vld [vmem:[%s3575_s29 + $0xc8] sm:$0xff]   ;;  %v3089_v9 = vld [vmem:[%s3575_s29 + $0xd0] sm:$0xff]  }
  0x16   : > { %3012 = vmatprep.mubr.msk.bf16.mxu1 %vm710_vm0, %v3084_v5  ;;  %v3088_v10 = vld [vmem:[%s3575_s29 + $0x18] sm:$0xff]   ;;  %v3091_v12 = vld [vmem:[%s3575_s29 + $0x20] sm:$0xff]   ;;  %v3092_v14 = vld [vmem:[%s3575_s29 + $0x28] sm:$0xff]  }
  0x17   : > { %2961 = vmatpush3.bf16.msra.mxu0 %v3081_v2  ;;  %3066 = vmatpush3.bf16.msra.mxu1 %v3081_v2  ;;  %v3090_v11 = vld [vmem:[%s3575_s29 + $0xd8] sm:$0xff]   ;;  %v3093_v13 = vld [vmem:[%s3575_s29 + $0xe0] sm:$0xff]   ;;  %v3094_v15 = vld [vmem:[%s3575_s29 + $0xe8] sm:$0xff]  }
  0x18   : > { %2962 = vmatprep.subr.bf16.mxu0 %v3082_v3  ;;  %3063 = vmatprep.subr.bf16.mxu1 %v3082_v3  ;;  %v3095_v16 = vld [vmem:[%s3575_s29 + $0x30] sm:$0xff]   ;;  %v3096_v18 = vld [vmem:[%s3575_s29 + $0x38] sm:$0xff]   ;;  %v3099_v20 = vld [vmem:[%s3575_s29 + $0x40] sm:$0xff]  }
  0x19   : > { %v3097_v17 = vld [vmem:[%s3575_s29 + $0xf0] sm:$0xff]   ;;  %v3098_v19 = vld [vmem:[%s3575_s29 + $0xf8] sm:$0xff]   ;;  %v3101_v21 = vld [vmem:[%s3575_s29 + $0x100] sm:$0xff]  }
  0x1a   : > { %v3100_v22 = vld [vmem:[%s3575_s29 + $0x48] sm:$0xff]   ;;  %v3103_v24 = vld [vmem:[%s3575_s29 + $0x50] sm:$0xff]   ;;  %v3104_v26 = vld [vmem:[%s3575_s29 + $0x58] sm:$0xff]  }
  0x1b   : > { %2963 = vmatpush3.bf16.msra.mxu0 %v3082_v3  ;;  %3067 = vmatpush3.bf16.msra.mxu1 %v3082_v3  ;;  %v3102_v23 = vld [vmem:[%s3575_s29 + $0x108] sm:$0xff]   ;;  %v3105_v25 = vld [vmem:[%s3575_s29 + $0x110] sm:$0xff]   ;;  %v3106_v27 = vld [vmem:[%s3575_s29 + $0x118] sm:$0xff]  }
  0x1c   : > { %v3107_v28 = vld [vmem:[%s3575_s29 + $0x60] sm:$0xff]   ;;  %v3108_v30 = vld [vmem:[%s3575_s29 + $0x68] sm:$0xff]   ;;  %v3111_v32 = vld [vmem:[%s3575_s29 + $0x70] sm:$0xff]  }
  0x1d   : > { %v3109_v29 = vld [vmem:[%s3575_s29 + $0x120] sm:$0xff]   ;;  %v3110_v31 = vld [vmem:[%s3575_s29 + $0x128] sm:$0xff]   ;;  %v3113_v33 = vld [vmem:[%s3575_s29 + $0x130] sm:$0xff]  }
  0x1e   : > { %2965 = vmatmul.mubr.msk.bf16.vlgmr.msra.gmra.mrb[0].mxu0 %vm710_vm0, %v3085_v6  ;;  %3013 = vmatmul.mubr.msk.bf16.vlgmr.msra.gmra.mrb[0].mxu1 %vm710_vm0, %v3086_v7  ;;  %v3112_v34 = vld [vmem:[%s3575_s29 + $0x78] sm:$0xff]   ;;  %v3115_v36 = vld [vmem:[%s3575_s29 + $0x80] sm:$0xff]   ;;  %v3116_v38 = vld [vmem:[%s3575_s29 + $0x88] sm:$0xff]  }
  0x1f   : > { %2968 = vmatprep.mubr.msk.bf16.mxu0 %vm710_vm0, %v3087_v8  ;;  %3016 = vmatprep.mubr.msk.bf16.mxu1 %vm710_vm0, %v3089_v9  ;;  %v3114_v35 = vld [vmem:[%s3575_s29 + $0x138] sm:$0xff]   ;;  %v3117_v37 = vld [vmem:[%s3575_s29 + $0x140] sm:$0xff]   ;;  %v3118_v39 = vld [vmem:[%s3575_s29 + $0x148] sm:$0xff]  }
  0x20   : > { %v3119_v40 = vld [vmem:[%s3575_s29 + $0x90] sm:$0xff]   ;;  %v3120_v42 = vld [vmem:[%s3575_s29 + $0x98] sm:$0xff]   ;;  %v3123_v44 = vld [vmem:[%s3575_s29 + $0xa0] sm:$0xff]  }
  0x21   : > { %v3121_v41 = vld [vmem:[%s3575_s29 + $0x150] sm:$0xff]   ;;  %v3122_v43 = vld [vmem:[%s3575_s29 + $0x158] sm:$0xff]   ;;  %v3125_v45 = vld [vmem:[%s3575_s29 + $0x160] sm:$0xff]  }
  0x22   : > { %v3124_v46 = vld [vmem:[%s3575_s29 + $0xa8] sm:$0xff]   ;;  %v3127_v48 = vld [vmem:[%s3575_s29 + $0xb0] sm:$0xff]   ;;  %v3128_v50 = vld [vmem:[%s3575_s29 + $0xb8] sm:$0xff]  }
  0x23   : > { %v3126_v47 = vld [vmem:[%s3575_s29 + $0x168] sm:$0xff]   ;;  %v3129_v49 = vld [vmem:[%s3575_s29 + $0x170] sm:$0xff]   ;;  %v3130_v51 = vld [vmem:[%s3575_s29 + $0x178] sm:$0xff]  }
  0x24   : > { %v352_v53 = vld [vmem:[%s3680_s7 + $0x10] sm:$0xff]  ;;  %v350_v55 = vld [vmem:[%s3680_s7] sm:$0xff]  ;;  %v353_v59 = vld [vmem:[%s3680_s7 + $0x18] sm:$0xff] }
  0x25   : > { %v400_v54 = vld [vmem:[%s3680_s7 + $0x190] sm:$0xff]  ;;  %v398_v56 = vld [vmem:[%s3680_s7 + $0x180] sm:$0xff]  ;;  %v401_v60 = vld [vmem:[%s3680_s7 + $0x198] sm:$0xff] }
  0x26   : > { %2969 = vmatmul.mubr.msk.bf16.gmra.mrb[4].mxu0 %vm710_vm0, %v3088_v10  ;;  %3017 = vmatmul.mubr.msk.bf16.gmra.mrb[4].mxu1 %vm710_vm0, %v3090_v11  ;;  %v351_v1 = vld [vmem:[%s3680_s7 + $0x8] sm:$0xff] }
  0x27   : > { %2972 = vmatprep.mubr.msk.bf16.mxu0 %vm710_vm0, %v3091_v12  ;;  %3020 = vmatprep.mubr.msk.bf16.mxu1 %vm710_vm0, %v3093_v13  ;;  %v399_v2 = vld [vmem:[%s3680_s7 + $0x188] sm:$0xff] }
  0x2e   : > { %2973 = vmatmul.mubr.msk.bf16.gmra.mrb[8].mxu0 %vm710_vm0, %v3092_v14  ;;  %3021 = vmatmul.mubr.msk.bf16.gmra.mrb[8].mxu1 %vm710_vm0, %v3094_v15 }
  0x2f   : > { %2976 = vmatprep.mubr.msk.bf16.mxu0 %vm710_vm0, %v3095_v16  ;;  %3024 = vmatprep.mubr.msk.bf16.mxu1 %vm710_vm0, %v3097_v17 }
  0x36   : > { %2977 = vmatmul.mubr.msk.bf16.gmra.mrb[12].mxu0 %vm710_vm0, %v3096_v18  ;;  %3025 = vmatmul.mubr.msk.bf16.gmra.mrb[12].mxu1 %vm710_vm0, %v3098_v19  ;;  %v356_v19 = vld [vmem:[%s3680_s7 + $0x30] sm:$0xff] }
  0x37   : > { %2980 = vmatprep.mubr.msk.bf16.mxu0 %vm710_vm0, %v3099_v20  ;;  %3028 = vmatprep.mubr.msk.bf16.mxu1 %vm710_vm0, %v3101_v21  ;;  %v404_v20 = vld [vmem:[%s3680_s7 + $0x1b0] sm:$0xff] }
  0x3e   : > { %2981 = vmatmul.mubr.msk.bf16.gmra.mrb[16].mxu0 %vm710_vm0, %v3100_v22  ;;  %3029 = vmatmul.mubr.msk.bf16.gmra.mrb[16].mxu1 %vm710_vm0, %v3102_v23 }
  0x3f   : > { %2984 = vmatprep.mubr.msk.bf16.mxu0 %vm710_vm0, %v3103_v24  ;;  %3032 = vmatprep.mubr.msk.bf16.mxu1 %vm710_vm0, %v3105_v25  ;;  %v357_v24 = vld [vmem:[%s3680_s7 + $0x38] sm:$0xff] }
  0x46   : > { %2985 = vmatmul.mubr.msk.bf16.gmra.mrb[20].mxu0 %vm710_vm0, %v3104_v26  ;;  %3033 = vmatmul.mubr.msk.bf16.gmra.mrb[20].mxu1 %vm710_vm0, %v3106_v27 }
  0x47   : > { %2988 = vmatprep.mubr.msk.bf16.mxu0 %vm710_vm0, %v3107_v28  ;;  %3036 = vmatprep.mubr.msk.bf16.mxu1 %vm710_vm0, %v3109_v29  ;;  %v354_v28 = vld [vmem:[%s3680_s7 + $0x20] sm:$0xff] }
  0x4e   : > { %2989 = vmatmul.mubr.msk.bf16.gmra.mrb[24].mxu0 %vm710_vm0, %v3108_v30  ;;  %3037 = vmatmul.mubr.msk.bf16.gmra.mrb[24].mxu1 %vm710_vm0, %v3110_v31 }
  0x4f   : > { %2992 = vmatprep.mubr.msk.bf16.mxu0 %vm710_vm0, %v3111_v32  ;;  %3040 = vmatprep.mubr.msk.bf16.mxu1 %vm710_vm0, %v3113_v33  ;;  %v355_v32 = vld [vmem:[%s3680_s7 + $0x28] sm:$0xff] }
  0x56   : > { %2993 = vmatmul.mubr.msk.bf16.gmra.mrb[28].mxu0 %vm710_vm0, %v3112_v34  ;;  %3041 = vmatmul.mubr.msk.bf16.gmra.mrb[28].mxu1 %vm710_vm0, %v3114_v35 }
  0x57   : > { %2996 = vmatprep.mubr.msk.bf16.mxu0 %vm710_vm0, %v3115_v36  ;;  %3044 = vmatprep.mubr.msk.bf16.mxu1 %vm710_vm0, %v3117_v37 }
  0x5e   : > { %2997 = vmatmul.mubr.msk.bf16.gmra.mrb[32].mxu0 %vm710_vm0, %v3116_v38  ;;  %3045 = vmatmul.mubr.msk.bf16.gmra.mrb[32].mxu1 %vm710_vm0, %v3118_v39 }
  0x5f   : > { %3000 = vmatprep.mubr.msk.bf16.mxu0 %vm710_vm0, %v3119_v40  ;;  %3048 = vmatprep.mubr.msk.bf16.mxu1 %vm710_vm0, %v3121_v41 }
  0x66   : > { %3001 = vmatmul.mubr.msk.bf16.gmra.mrb[36].mxu0 %vm710_vm0, %v3120_v42  ;;  %3049 = vmatmul.mubr.msk.bf16.gmra.mrb[36].mxu1 %vm710_vm0, %v3122_v43 }
  0x67   : > { %3004 = vmatprep.mubr.msk.bf16.mxu0 %vm710_vm0, %v3123_v44  ;;  %3052 = vmatprep.mubr.msk.bf16.mxu1 %vm710_vm0, %v3125_v45 }
  0x6e   : > { %3005 = vmatmul.mubr.msk.bf16.gmra.mrb[40].mxu0 %vm710_vm0, %v3124_v46  ;;  %3053 = vmatmul.mubr.msk.bf16.gmra.mrb[40].mxu1 %vm710_vm0, %v3126_v47 }
  0x6f   : > { %3008 = vmatprep.mubr.msk.bf16.mxu0 %vm710_vm0, %v3127_v48  ;;  %3056 = vmatprep.mubr.msk.bf16.mxu1 %vm710_vm0, %v3129_v49 }
  0x76   : > { %3009 = vmatmul.mubr.msk.bf16.gmra.mrb[44].mxu0 %vm710_vm0, %v3128_v50  ;;  %3057 = vmatmul.mubr.msk.bf16.gmra.mrb[44].mxu1 %vm710_vm0, %v3130_v51 }
  0xf1   : > { %v2966_v57 = vpop.f32.mrb[0].mxu0  ;;  %v3014_v58 = vpop.f32.mrb[0].mxu1 }
  0xf2   : > { %v898_v61 = vadd.f32 %v2966_v57, %v352_v53  ;;  %v1090_v62 = vadd.f32 %v3014_v58, %v400_v54  ;;  %v889_v63 = vpop.f32.mrb[1].mxu0  ;;  %v1081_v0 = vpop.f32.mrb[1].mxu1 }
  0xf3   : > { %v890_v3 = vadd.f32 %v889_v63, %v350_v55  ;;  %v1082_v4 = vadd.f32 %v1081_v0, %v398_v56  ;;  %v2967_v5 = vpop.f32.mrb[2].mxu0  ;;  %v3015_v6 = vpop.f32.mrb[2].mxu1  ;;  %v402_v63 = vld [vmem:[%s3680_s7 + $0x1a0] sm:$0xff] }
  0xf4   : > { %v2808_v7 = vmul.f32 -1.442695, %v898_v61  ;;  %v2856_v8 = vmul.f32 -1.442695, %v1090_v62  ;;  %v901_v9 = vadd.f32 %v2967_v5, %v353_v59  ;;  %v1093_v10 = vadd.f32 %v3015_v6, %v401_v60  ;;  %v892_v11 = vpop.f32.mrb[3].mxu0  ;;  %v1084_v12 = vpop.f32.mrb[3].mxu1 }
  0xf5   : > { %v2806_v13 = vmul.f32 -1.442695, %v890_v3  ;;  %v2854_v14 = vmul.f32 -1.442695, %v1082_v4  ;;  %v893_v15 = vadd.f32 %v892_v11, %v351_v1  ;;  %v1085_v16 = vadd.f32 %v1084_v12, %v399_v2  ;;  %v405_v2 = vld [vmem:[%s3680_s7 + $0x1b8] sm:$0xff]  ;;  %v403_v5 = vld [vmem:[%s3680_s7 + $0x1a8] sm:$0xff] }
  0xf6   : > { %3131 = vpow2.f32 %v2808_v7  ;;  %v2809_v17 = vmul.f32 -1.442695, %v901_v9  ;;  %v2857_v18 = vmul.f32 -1.442695, %v1093_v10  ;;  %v360_v9 = vld [vmem:[%s3680_s7 + $0x50] sm:$0xff]  ;;  %v358_v12 = vld [vmem:[%s3680_s7 + $0x40] sm:$0xff] }
  0xf7   : > { %3133 = vpow2.f32 %v2856_v8  ;;  %v2807_v21 = vmul.f32 -1.442695, %v893_v15  ;;  %v2855_v22 = vmul.f32 -1.442695, %v1085_v16 }
  0xf8   : > { %3135 = vpow2.f32 %v2806_v13 }
  0xf9   : > { %3137 = vpow2.f32 %v2854_v14  ;;  %v2970_v23 = vpop.f32.mrb[4].mxu0  ;;  %v3018_v25 = vpop.f32.mrb[4].mxu1 }
  0xfa   : > { %3139 = vpow2.f32 %v2809_v17  ;;  %v914_v26 = vadd.f32 %v2970_v23, %v356_v19  ;;  %v905_v27 = vpop.f32.mrb[5].mxu0  ;;  %v1106_v29 = vadd.f32 %v3018_v25, %v404_v20  ;;  %v1097_v30 = vpop.f32.mrb[5].mxu1  ;;  %v361_v17 = vld [vmem:[%s3680_s7 + $0x58] sm:$0xff] }
  0xfb   : > { %3141 = vpow2.f32 %v2857_v18  ;;  %v2971_v31 = vpop.f32.mrb[6].mxu0  ;;  %v3019_v33 = vpop.f32.mrb[6].mxu1  ;;  %v906_v38 = vadd.f32 %v905_v27, %v354_v28  ;;  %v1098_v8 = vadd.f32 %v1097_v30, %v402_v63  ;;  %v408_v27 = vld [vmem:[%s3680_s7 + $0x1d0] sm:$0xff] }
  0xfc   : > { %3143 = vpow2.f32 %v2807_v21  ;;  %v2812_v34 = vmul.f32 -1.442695, %v914_v26  ;;  %v917_v35 = vadd.f32 %v2971_v31, %v357_v24  ;;  %v908_v36 = vpop.f32.mrb[7].mxu0  ;;  %v1100_v37 = vpop.f32.mrb[7].mxu1  ;;  %v2860_v41 = vmul.f32 -1.442695, %v1106_v29 }
  0xfd   : > { %3145 = vpow2.f32 %v2855_v22  ;;  %v909_v40 = vadd.f32 %v908_v36, %v355_v32  ;;  %v2810_v45 = vmul.f32 -1.442695, %v906_v38  ;;  %v1109_v11 = vadd.f32 %v3019_v33, %v405_v2  ;;  %v359_v21 = vld [vmem:[%s3680_s7 + $0x48] sm:$0xff] }
  0xfe   : > { %3147 = vpow2.f32 %v2812_v34  ;;  %v2813_v39 = vmul.f32 -1.442695, %v917_v35  ;;  %v1101_v16 = vadd.f32 %v1100_v37, %v403_v5  ;;  %v2858_v25 = vmul.f32 -1.442695, %v1098_v8  ;;  %v406_v34 = vld [vmem:[%s3680_s7 + $0x1c0] sm:$0xff] }
  0xff   : > { %v2811_v50 = vmul.f32 -1.442695, %v909_v40  ;;  %v2861_v32 = vmul.f32 -1.442695, %v1109_v11 }
 0x100   : > { %v3132_v42 = vpop.eup %3131  ;;  %3149 = vpow2.f32 %v2813_v39  ;;  %v2859_v37 = vmul.f32 -1.442695, %v1101_v16  ;;  %v409_v39 = vld [vmem:[%s3680_s7 + $0x1d8] sm:$0xff] }
 0x101   : > { %v3134_v43 = vpop.eup %3133  ;;  %v1562_v44 = vadd.f32 1.0, %v3132_v42  ;;  %v2974_v46 = vpop.f32.mrb[8].mxu0  ;;  %3151 = vpow2.f32 %v2860_v41 }
 0x102   : > { %v3695_v47 = vpop.f32.mrb[8].mxu1  ;;  %v3136_v48 = vpop.eup %3135  ;;  %v1610_v49 = vadd.f32 1.0, %v3134_v43  ;;  %v930_v20 = vadd.f32 %v2974_v46, %v360_v9 }
 0x103   : > { %v921_v51 = vpop.f32.mrb[9].mxu0  ;;  %v3697_v52 = vpop.f32.mrb[9].mxu1  ;;  %3153 = vrcp.f32 %v1562_v44  ;;  %v1560_v57 = vadd.f32 1.0, %v3136_v48  ;;  %v1122_v42 = vadd.f32 %v3695_v47, %v408_v27 }
 0x104   : > { %v3138_v53 = vpop.eup %3137  ;;  %v2975_v54 = vpop.f32.mrb[10].mxu0  ;;  %3155 = vrcp.f32 %v1610_v49  ;;  %v922_v26 = vadd.f32 %v921_v51, %v358_v12  ;;  %v2816_v41 = vmul.f32 -1.442695, %v930_v20 }
 0x105   : > { %v3699_v55 = vpop.f32.mrb[10].mxu1  ;;  %v3140_v56 = vpop.eup %3139  ;;  %v1608_v61 = vadd.f32 1.0, %v3138_v53  ;;  %3157 = vpow2.f32 %v2810_v45  ;;  %v933_v33 = vadd.f32 %v2975_v54, %v361_v17  ;;  %v1114_v45 = vadd.f32 %v3697_v52, %v406_v34  ;;  %v407_v53 = vld [vmem:[%s3680_s7 + $0x1c8] sm:$0xff] }
 0x106   : > { %v924_v58 = vpop.f32.mrb[11].mxu0  ;;  %v3701_v59 = vpop.f32.mrb[11].mxu1  ;;  %v1563_v62 = vadd.f32 1.0, %v3140_v56  ;;  %3159 = vpow2.f32 %v2811_v50  ;;  %v2814_v44 = vmul.f32 -1.442695, %v922_v26  ;;  %v1125_v49 = vadd.f32 %v3699_v55, %v409_v39 }
 0x107   : > { %v3142_v60 = vpop.eup %3141  ;;  %v925_v38 = vadd.f32 %v924_v58, %v359_v21  ;;  %v2817_v48 = vmul.f32 -1.442695, %v933_v33  ;;  %v1117_v2 = vadd.f32 %v3701_v59, %v407_v53 }
 0x108   : > { %v3144_v0 = vpop.eup %3143  ;;  %v1611_v1 = vadd.f32 1.0, %v3142_v60  ;;  %3161 = vrcp.f32 %v1563_v62  ;;  %v2862_v60 = vmul.f32 -1.442695, %v1114_v45 }
 0x109   : > { %v3146_v3 = vpop.eup %3145  ;;  %v1561_v4 = vadd.f32 1.0, %v3144_v0  ;;  %3163 = vrcp.f32 %v1560_v57  ;;  %v3708_v13 = vpop.f32.mrb[12].mxu0  ;;  %v2815_v51 = vmul.f32 -1.442695, %v925_v38  ;;  %v2864_v57 = vmul.f32 -1.442695, %v1122_v42 }
 0x10a   : > { %v3148_v6 = vpop.eup %3147  ;;  %v1609_v7 = vadd.f32 1.0, %v3146_v3  ;;  %3165 = vrcp.f32 %v1608_v61  ;;  %v3710_v14 = vpop.f32.mrb[12].mxu1  ;;  %v364_v61 = vld [vmem:[%s3680_s7 + $0x70] sm:$0xff]  ;;  %v2863_v59 = vmul.f32 -1.442695, %v1117_v2 }
 0x10b   : > { %v1566_v10 = vadd.f32 1.0, %v3148_v6  ;;  %v3150_v15 = vpop.eup %3149  ;;  %3167 = vrcp.f32 %v1611_v1  ;;  %v3713_v18 = vpop.f32.mrb[13].mxu0  ;;  %v2865_v1 = vmul.f32 -1.442695, %v1125_v49  ;;  %v362_v6 = vld [vmem:[%s3680_s7 + $0x60] sm:$0xff]  ;;  %v946_v9 = vadd.f32 %v3708_v13, %v364_v61 }
 0x10c   : > { %3169 = vrcp.f32 %v1561_v4  ;;  %v1567_v19 = vadd.f32 1.0, %v3150_v15  ;;  %v3716_v22 = vpop.f32.mrb[14].mxu0  ;;  %v3718_v23 = vpop.f32.mrb[13].mxu1  ;;  %v938_v15 = vadd.f32 %v3713_v18, %v362_v6  ;;  %v411_v6 = vld [vmem:[%s3680_s7 + $0x1e8] sm:$0xff] }
 0x10d   : > { %v3152_v24 = vpop.eup %3151  ;;  %3171 = vrcp.f32 %v1609_v7  ;;  %v3721_v28 = vpop.f32.mrb[15].mxu0  ;;  %v2820_v13 = vmul.f32 -1.442695, %v946_v9 }
 0x10e   : > { %v3723_v29 = vpop.f32.mrb[14].mxu1  ;;  %v3154_v30 = vpop.eup %3153  ;;  %3173 = vrcp.f32 %v1566_v10  ;;  %v1614_v31 = vadd.f32 1.0, %v3152_v24  ;;  %v2818_v34 = vmul.f32 -1.442695, %v938_v15 }
 0x10f   : > { %v3726_v35 = vpop.f32.mrb[15].mxu1  ;;  %v3156_v36 = vpop.eup %3155  ;;  %3175 = vrcp.f32 %v1567_v19  ;;  %1956 = vperm.xlu1 %3077, %v3154_v30  }
 0x110   : > { %v3158_v40 = vpop.eup %3157  ;;  %3177 = vrcp.f32 %v1614_v31  ;;  %2196 = vperm.xlu0 %3078, %v3156_v36  }
 0x111   : > { %v3160_v43 = vpop.eup %3159  ;;  %3179 = vpow2.f32 %v2858_v25  ;;  %v3733_v54 = vpop.f32.mrb[16].mxu0  ;;  %v1564_v8 = vadd.f32 1.0, %v3158_v40  ;;  %v365_v40 = vld [vmem:[%s3680_s7 + $0x78] sm:$0xff] }
 0x112   : > { %v3162_v46 = vpop.eup %3161  ;;  %3181 = vpow2.f32 %v2861_v32  ;;  %v3735_v56 = vpop.f32.mrb[16].mxu1  ;;  %v1565_v11 = vadd.f32 1.0, %v3160_v43  ;;  %v363_v43 = vld [vmem:[%s3680_s7 + $0x68] sm:$0xff]  ;;  %v949_v53 = vadd.f32 %v3716_v22, %v365_v40 }
 0x113   : > { %v3164_v50 = vpop.eup %3163  ;;  %3183 = vpow2.f32 %v2859_v37  ;;  %1961 = vperm.xlu1 %3077, %v3162_v46   ;;  %v3737_v52 = vpop.f32.mrb[17].mxu0  ;;  %v412_v46 = vld [vmem:[%s3680_s7 + $0x1f0] sm:$0xff]  ;;  %v941_v61 = vadd.f32 %v3721_v28, %v363_v43 }
 0x114   : > { %v3166_v47 = vpop.eup %3165  ;;  %3185 = vpow2.f32 %v2816_v41  ;;  %1946 = vperm.xlu0 %3078, %v3164_v50   ;;  %v3739_v58 = vpop.f32.mrb[17].mxu1  ;;  %v1138_v22 = vadd.f32 %v3710_v14, %v412_v46  ;;  %v2821_v15 = vmul.f32 -1.442695, %v949_v53  ;;  %v366_v14 = vld [vmem:[%s3680_s7 + $0x80] sm:$0xff] }
 0x115   : > { %v3168_v55 = vpop.eup %3167  ;;  %3187 = vpow2.f32 %v2814_v44  ;;  %v3742_v62 = vpop.f32.mrb[18].mxu0 }
 0x116   : > { %v3744_v63 = vpop.f32.mrb[18].mxu1  ;;  %v3170_v0 = vpop.eup %3169  ;;  %3189 = vpow2.f32 %v2817_v48 }
 0x117   : > { %v3747_v3 = vpop.f32.mrb[19].mxu0  ;;  %v3749_v4 = vpop.f32.mrb[19].mxu1  ;;  %3191 = vpow2.f32 %v2815_v51  ;;  %2201 = vperm.xlu1 %3077, %v3168_v55  }
 0x118   : > { %v3172_v5 = vpop.eup %3171  ;;  %3193 = vpow2.f32 %v2864_v57  ;;  %2186 = vperm.xlu0 %3078, %v3166_v47   ;;  %v410_v47 = vld [vmem:[%s3680_s7 + $0x1e0] sm:$0xff] }
 0x119   : > { %v3174_v7 = vpop.eup %3173  ;;  %3195 = vpow2.f32 %v2862_v60  ;;  %v3754_v16 = vpop.f32.mrb[20].mxu0 }
 0x11a   : > { %v3176_v10 = vpop.eup %3175  ;;  %3197 = vpow2.f32 %v2865_v1  ;;  %v3756_v17 = vpop.f32.mrb[20].mxu1 }
 0x11b   : > { %v3178_v12 = vpop.eup %3177  ;;  %2191 = vperm.xlu1 %3077, %v3172_v5   ;;  %v3758_v20 = vpop.f32.mrb[21].mxu0  ;;  %3199 = vrcp.f32 %v1564_v8 }
 0x11c   : > { %v3180_v19 = vpop.eup %3179  ;;  %v3760_v21 = vpop.f32.mrb[21].mxu1  ;;  %1951 = vperm.xlu0 %3078, %v3170_v0   ;;  %3201 = vrcp.f32 %v1565_v11  ;;  %v413_v0 = vld [vmem:[%s3680_s7 + $0x1f8] sm:$0xff]  ;;  %v368_v11 = vld [vmem:[%s3680_s7 + $0x90] sm:$0xff] }
 0x11d   : > { %v3182_v24 = vpop.eup %3181  ;;  %v3762_v25 = vpop.f32.mrb[22].mxu0  ;;  %v1612_v18 = vadd.f32 1.0, %v3180_v19  ;;  %3203 = vpow2.f32 %v2863_v59  ;;  %v1141_v19 = vadd.f32 %v3723_v29, %v413_v0  ;;  %v954_v29 = vadd.f32 %v3737_v52, %v366_v14 }
 0x11e   : > { %v3764_v26 = vpop.f32.mrb[22].mxu1  ;;  %v3184_v27 = vpop.eup %3183  ;;  %v1615_v30 = vadd.f32 1.0, %v3182_v24 }
 0x11f   : > { %v3766_v31 = vpop.f32.mrb[23].mxu0  ;;  %v3768_v32 = vpop.f32.mrb[23].mxu1  ;;  %v1613_v37 = vadd.f32 1.0, %v3184_v27  ;;  %1981 = vperm.xlu1 %3077, %v3176_v10   ;;  %v1130_v10 = vadd.f32 %v3718_v23, %v410_v47  ;;  %v1133_v27 = vadd.f32 %v3726_v35, %v411_v6  ;;  %v2868_v23 = vmul.f32 -1.442695, %v1138_v22 }
 0x120   : > { %v3186_v33 = vpop.eup %3185  ;;  %3205 = vrcp.f32 %v1615_v30  ;;  %1976 = vperm.xlu0 %3078, %v3174_v7   ;;  %v2869_v35 = vmul.f32 -1.442695, %v1141_v19  ;;  %v2822_v47 = vmul.f32 -1.442695, %v954_v29 }
 0x121   : > { %v3188_v36 = vpop.eup %3187  ;;  %v1570_v39 = vadd.f32 1.0, %v3186_v33  ;;  %3207 = vpow2.f32 %v2820_v13  ;;  %v3773_v48 = vpop.f32.mrb[24].mxu0  ;;  %v2819_v13 = vmul.f32 -1.442695, %v941_v61  ;;  %v962_v33 = vadd.f32 %v3733_v54, %v368_v11 }
 0x122   : > { %v3190_v38 = vpop.eup %3189  ;;  %3209 = vrcp.f32 %v1612_v18  ;;  %v1568_v42 = vadd.f32 1.0, %v3188_v36  ;;  %v3775_v49 = vpop.f32.mrb[24].mxu1  ;;  %v369_v18 = vld [vmem:[%s3680_s7 + $0x98] sm:$0xff]  ;;  %v2866_v36 = vmul.f32 -1.442695, %v1130_v10 }
 0x123   : > { %v3192_v41 = vpop.eup %3191  ;;  %v1571_v45 = vadd.f32 1.0, %v3190_v38  ;;  %3211 = vpow2.f32 %v2818_v34  ;;  %v3779_v57 = vpop.f32.mrb[25].mxu0  ;;  %v965_v40 = vadd.f32 %v3742_v62, %v369_v18 }
 0x124   : > { %v3194_v44 = vpop.eup %3193  ;;  %3213 = vrcp.f32 %v1613_v37  ;;  %v1569_v51 = vadd.f32 1.0, %v3192_v41  ;;  %2216 = vperm.xlu0 %3078, %v3178_v12   ;;  %v3783_v1 = vpop.f32.mrb[26].mxu0  ;;  %v416_v41 = vld [vmem:[%s3680_s7 + $0x210] sm:$0xff] }
 0x125   : > { %v3196_v50 = vpop.eup %3195  ;;  %3215 = vrcp.f32 %v1570_v39  ;;  %v1618_v60 = vadd.f32 1.0, %v3194_v44  ;;  %v3785_v2 = vpop.f32.mrb[25].mxu1  ;;  %v2867_v44 = vmul.f32 -1.442695, %v1133_v27  ;;  %v2825_v0 = vmul.f32 -1.442695, %v965_v40 }
 0x126   : > { %v3198_v55 = vpop.eup %3197  ;;  %3217 = vrcp.f32 %v1568_v42  ;;  %v1616_v5 = vadd.f32 1.0, %v3196_v50  ;;  %v3789_v7 = vpop.f32.mrb[27].mxu0  ;;  %v2824_v50 = vmul.f32 -1.442695, %v962_v33 }
 0x127   : > { %v3791_v8 = vpop.f32.mrb[26].mxu1  ;;  %v3200_v9 = vpop.eup %3199  ;;  %3219 = vrcp.f32 %v1571_v45  ;;  %v1619_v28 = vadd.f32 1.0, %v3198_v55  ;;  %v367_v55 = vld [vmem:[%s3680_s7 + $0x88] sm:$0xff] }
 0x128   : > { %v3795_v12 = vpop.f32.mrb[27].mxu1  ;;  %v3202_v59 = vpop.eup %3201  ;;  %3221 = vrcp.f32 %v1569_v51  ;;  %1966 = vperm.xlu0 %3078, %v3200_v9   ;;  %v957_v9 = vadd.f32 %v3747_v3, %v367_v55 }
 0x129   : > { %v3204_v24 = vpop.eup %3203  ;;  %3223 = vrcp.f32 %v1618_v60  ;;  %v3803_v37 = vpop.f32.mrb[28].mxu0  ;;  %v1154_v60 = vadd.f32 %v3735_v56, %v416_v41 }
 0x12a   : > { %v3206_v30 = vpop.eup %3205  ;;  %3225 = vrcp.f32 %v1616_v5  ;;  %v3805_v38 = vpop.f32.mrb[28].mxu1  ;;  %v1617_v14 = vadd.f32 1.0, %v3204_v24 }
 0x12b   : > { %v3208_v34 = vpop.eup %3207  ;;  %3227 = vrcp.f32 %v1619_v28  ;;  %2221 = vperm.xlu1 %3077, %v3206_v30   ;;  %v3809_v42 = vpop.f32.mrb[29].mxu0  ;;  %v414_v28 = vld [vmem:[%s3680_s7 + $0x200] sm:$0xff]  ;;  %v2872_v11 = vmul.f32 -1.442695, %v1154_v60 }
 0x12c   : > { %v3210_v39 = vpop.eup %3209  ;;  %3229 = vpow2.f32 %v2821_v15  ;;  %v3811_v43 = vpop.f32.mrb[29].mxu1  ;;  %v1574_v6 = vadd.f32 1.0, %v3208_v34  ;;  %v1146_v3 = vadd.f32 %v3739_v58, %v414_v28 }
 0x12d   : > { %v3212_v54 = vpop.eup %3211  ;;  %3231 = vpow2.f32 %v2819_v13  ;;  %2206 = vperm.xlu0 %3078, %v3210_v39   ;;  %v3813_v52 = vpop.f32.mrb[30].mxu0 }
 0x12e   : > { %v3815_v45 = vpop.f32.mrb[30].mxu1  ;;  %v3214_v46 = vpop.eup %3213  ;;  %3233 = vpow2.f32 %v2868_v23  ;;  %v1572_v30 = vadd.f32 1.0, %v3212_v54 }
 0x12f   : > { %v3817_v51 = vpop.f32.mrb[31].mxu0  ;;  %v3819_v62 = vpop.f32.mrb[31].mxu1  ;;  %3235 = vpow2.f32 %v2866_v36  ;;  %1971 = vperm.xlu1 %3077, %v3202_v59   ;;  %v417_v59 = vld [vmem:[%s3680_s7 + $0x218] sm:$0xff]  ;;  %v2823_v36 = vmul.f32 -1.442695, %v957_v9 }
 0x130   : > { %v3216_v53 = vpop.eup %3215  ;;  %3237 = vpow2.f32 %v2869_v35  ;;  %v1157_v29 = vadd.f32 %v3744_v63, %v417_v59 }
 0x131   : > { %v3218_v61 = vpop.eup %3217  ;;  %3239 = vpow2.f32 %v2867_v44  ;;  %1996 = vperm.xlu0 %3078, %v3216_v53   ;;  %v3828_v56 = vpop.f32.mrb[32].mxu0  ;;  %v2870_v44 = vmul.f32 -1.442695, %v1146_v3  ;;  %v370_v3 = vld [vmem:[%s3680_s7 + $0xa0] sm:$0xff] }
 0x132   : > { %v3220_v5 = vpop.eup %3219  ;;  %3241 = vpow2.f32 %v2824_v50  ;;  %v3830_v15 = vpop.f32.mrb[32].mxu1  ;;  %v2873_v63 = vmul.f32 -1.442695, %v1157_v29 }
 0x133   : > { %v3823_v22 = vpop.eup %3221  ;;  %2211 = vperm.xlu1 %3077, %v3214_v46   ;;  %3243 = vpow2.f32 %v2822_v47  ;;  %v3832_v13 = vpop.f32.mrb[33].mxu0  ;;  %v415_v47 = vld [vmem:[%s3680_s7 + $0x208] sm:$0xff] }
 0x134   : > { %v3224_v10 = vpop.eup %3223  ;;  %3245 = vpow2.f32 %v2825_v0  ;;  %v3834_v27 = vpop.f32.mrb[33].mxu1 }
 0x135   : > { %v3226_v19 = vpop.eup %3225  ;;  %2236 = vperm.xlu0 %3078, %v3224_v10   ;;  %v3837_v23 = vpop.f32.mrb[34].mxu0  ;;  %3247 = vrcp.f32 %v1574_v6  ;;  %v372_v6 = vld [vmem:[%s3680_s7 + $0xb0] sm:$0xff] }
 0x136   : > { %v3228_v18 = vpop.eup %3227  ;;  %v3839_v33 = vpop.f32.mrb[34].mxu1  ;;  %3249 = vpow2.f32 %v2872_v11 }
 0x137   : > { %v3230_v34 = vpop.eup %3229  ;;  %v3842_v24 = vpop.f32.mrb[35].mxu0  ;;  %2001 = vperm.xlu1 %3077, %v3220_v5   ;;  %3251 = vrcp.f32 %v1617_v14 }
 0x138   : > { %v3844_v39 = vpop.f32.mrb[35].mxu1  ;;  %v3232_v35 = vpop.eup %3231  ;;  %v1575_v58 = vadd.f32 1.0, %v3230_v34  ;;  %3253 = vrcp.f32 %v1572_v30  ;;  %v1149_v30 = vadd.f32 %v3749_v4, %v415_v47 }
 0x139   : > { %v3234_v40 = vpop.eup %3233  ;;  %1986 = vperm.xlu0 %3078, %v3218_v61   ;;  %3255 = vpow2.f32 %v2823_v36  ;;  %v1573_v53 = vadd.f32 1.0, %v3232_v35  ;;  %v3847_v55 = vpop.f32.mrb[36].mxu0  ;;  %v373_v35 = vld [vmem:[%s3680_s7 + $0xb8] sm:$0xff] }
 0x13a   : > { %v3236_v41 = vpop.eup %3235  ;;  %v1622_v54 = vadd.f32 1.0, %v3234_v40  ;;  %v3849_v60 = vpop.f32.mrb[36].mxu1 }
 0x13b   : > { %v3238_v46 = vpop.eup %3237  ;;  %2241 = vperm.xlu1 %3077, %v3228_v18   ;;  %v3852_v9 = vpop.f32.mrb[37].mxu0  ;;  %v1620_v10 = vadd.f32 1.0, %v3236_v41  ;;  %v420_v41 = vld [vmem:[%s3680_s7 + $0x230] sm:$0xff] }
 0x13c   : > { %v3240_v50 = vpop.eup %3239  ;;  %3257 = vrcp.f32 %v1622_v54  ;;  %v1623_v5 = vadd.f32 1.0, %v3238_v46  ;;  %v3854_v61 = vpop.f32.mrb[37].mxu1  ;;  %v371_v46 = vld [vmem:[%s3680_s7 + $0xa8] sm:$0xff] }
 0x13d   : > { %v3242_v0 = vpop.eup %3241  ;;  %3259 = vrcp.f32 %v1575_v58  ;;  %2226 = vperm.xlu0 %3078, %v3226_v19   ;;  %v3856_v11 = vpop.f32.mrb[38].mxu0  ;;  %v1621_v18 = vadd.f32 1.0, %v3240_v50  ;;  %v978_v19 = vadd.f32 %v3754_v16, %v372_v6  ;;  %v2871_v50 = vmul.f32 -1.442695, %v1149_v30  ;;  %v418_v16 = vld [vmem:[%s3680_s7 + $0x220] sm:$0xff] }
 0x13e   : > { %v3244_v28 = vpop.eup %3243  ;;  %3261 = vpow2.f32 %v2870_v44  ;;  %v3858_v59 = vpop.f32.mrb[38].mxu1  ;;  %v1578_v29 = vadd.f32 1.0, %v3242_v0  ;;  %v970_v44 = vadd.f32 %v3758_v20, %v370_v3  ;;  %v1170_v0 = vadd.f32 %v3756_v17, %v420_v41 }
 0x13f   : > { %v3246_v14 = vpop.eup %3245  ;;  %3263 = vpow2.f32 %v2873_v63  ;;  %v3862_v34 = vpop.f32.mrb[39].mxu0  ;;  %1991 = vperm.xlu1 %3077, %v3823_v22   ;;  %v1576_v58 = vadd.f32 1.0, %v3244_v28  ;;  %v981_v22 = vadd.f32 %v3762_v25, %v373_v35  ;;  %v2828_v47 = vmul.f32 -1.442695, %v978_v19 }
 0x140   : > { %v3864_v36 = vpop.f32.mrb[39].mxu1  ;;  %3265 = vrcp.f32 %v1573_v53  ;;  %v3248_v40 = vpop.eup %3247  ;;  %v1579_v4 = vadd.f32 1.0, %v3246_v14  ;;  %v973_v14 = vadd.f32 %v3766_v31, %v371_v46  ;;  %v2826_v3 = vmul.f32 -1.442695, %v970_v44  ;;  %v376_v44 = vld [vmem:[%s3680_s7 + $0xd0] sm:$0xff] }
 0x141   : > { %3267 = vrcp.f32 %v1623_v5  ;;  %v3250_v54 = vpop.eup %3249  ;;  %2016 = vperm.xlu0 %3078, %v3248_v40   ;;  %v421_v5 = vld [vmem:[%s3680_s7 + $0x238] sm:$0xff]  ;;  %v3876_v6 = vpop.f32.mrb[40].mxu0  ;;  %v1162_v17 = vadd.f32 %v3760_v21, %v418_v16  ;;  %v2876_v21 = vmul.f32 -1.442695, %v1170_v0 }
 0x142   : > { %3269 = vrcp.f32 %v1620_v10  ;;  %v3252_v63 = vpop.eup %3251  ;;  %v3878_v28 = vpop.f32.mrb[40].mxu1  ;;  %v1626_v10 = vadd.f32 1.0, %v3250_v54  ;;  %v1173_v31 = vadd.f32 %v3764_v26, %v421_v5  ;;  %v377_v0 = vld [vmem:[%s3680_s7 + $0xd8] sm:$0xff] }
 0x143   : > { %3271 = vrcp.f32 %v1621_v18  ;;  %v3254_v53 = vpop.eup %3253  ;;  %2231 = vperm.xlu1 %3077, %v3252_v63   ;;  %v3883_v25 = vpop.f32.mrb[41].mxu0  ;;  %v2827_v63 = vmul.f32 -1.442695, %v973_v14  ;;  %v2874_v26 = vmul.f32 -1.442695, %v1162_v17 }
 0x144   : > { %3273 = vrcp.f32 %v1578_v29  ;;  %v3880_v20 = vpop.eup %3255  ;;  %v3885_v18 = vpop.f32.mrb[41].mxu1  ;;  %v419_v29 = vld [vmem:[%s3680_s7 + $0x228] sm:$0xff]  ;;  %v2877_v5 = vmul.f32 -1.442695, %v1173_v31 }
 0x145   : > { %3275 = vrcp.f32 %v1576_v58  ;;  %v3889_v19 = vpop.f32.mrb[42].mxu0  ;;  %v3891_v35 = vpop.f32.mrb[42].mxu1  ;;  %v2829_v58 = vmul.f32 -1.442695, %v981_v22 }
 0x146   : > { %v3258_v30 = vpop.eup %3257  ;;  %3277 = vrcp.f32 %v1579_v4  ;;  %v3894_v41 = vpop.f32.mrb[43].mxu0 }
 0x147   : > { %v3260_v40 = vpop.eup %3259  ;;  %3279 = vpow2.f32 %v2871_v50  ;;  %2256 = vperm.xlu0 %3078, %v3258_v30   ;;  %v3896_v54 = vpop.f32.mrb[43].mxu1  ;;  %v1165_v50 = vadd.f32 %v3768_v32, %v419_v29  ;;  %v994_v30 = vadd.f32 %v3773_v48, %v376_v44 }
 0x148   : > { %4320 = vst [vmem:[#allocation2_spill] sm:$0xff] %v3896_v54  ;;  %v3262_v4 = vpop.eup %3261  ;;  %3281 = vpow2.f32 %v2828_v47  ;;  %2021 = vperm.xlu1 %3077, %v3260_v40   ;;  %v374_v47 = vld [vmem:[%s3680_s7 + $0xc0] sm:$0xff] }
 0x149   : > { %v3264_v46 = vpop.eup %3263  ;;  %3283 = vrcp.f32 %v1626_v10  ;;  %v3903_v10 = vpop.f32.mrb[44].mxu0  ;;  %v986_v48 = vadd.f32 %v3779_v57, %v374_v47  ;;  %v2832_v44 = vmul.f32 -1.442695, %v994_v30 }
 0x14a   : > { %v3266_v22 = vpop.eup %3265  ;;  %3285 = vpow2.f32 %v2826_v3  ;;  %v1627_v40 = vadd.f32 1.0, %v3264_v46  ;;  %v3905_v14 = vpop.f32.mrb[44].mxu1  ;;  %v2875_v3 = vmul.f32 -1.442695, %v1165_v50  ;;  %v997_v46 = vadd.f32 %v3783_v1, %v377_v0 }
 0x14b   : > { %v3268_v16 = vpop.eup %3267  ;;  %3287 = vpow2.f32 %v2829_v58  ;;  %2006 = vperm.xlu0 %3078, %v3254_v53   ;;  %4321 = vst [vmem:[#allocation3_spill] sm:$0xff] %v3905_v14  ;;  %v3907_v17 = vpop.f32.mrb[45].mxu0 }
 0x14c   : > { %v3270_v54 = vpop.eup %3269  ;;  %3289 = vpow2.f32 %v2876_v21  ;;  %2261 = vperm.xlu1 %3077, %v3268_v16   ;;  %v3909_v29 = vpop.f32.mrb[45].mxu1  ;;  %v2833_v1 = vmul.f32 -1.442695, %v997_v46 }
 0x14d   : > { %v3272_v32 = vpop.eup %3271  ;;  %3291 = vpow2.f32 %v2827_v63  ;;  %4322 = vst [vmem:[#allocation4_spill] sm:$0xff] %v3909_v29  ;;  %v3912_v58 = vpop.f32.mrb[46].mxu0  ;;  %v375_v63 = vld [vmem:[%s3680_s7 + $0xc8] sm:$0xff]  ;;  %v1624_v29 = vadd.f32 1.0, %v3262_v4 }
 0x14e   : > { %v3274_v53 = vpop.eup %3273  ;;  %3293 = vpow2.f32 %v2874_v26  ;;  %v3914_v31 = vpop.f32.mrb[46].mxu1  ;;  %v1577_v26 = vadd.f32 1.0, %v3880_v20 }
 0x14f   : > { %4323 = vst [vmem:[#allocation5_spill] sm:$0xff] %v3914_v31  ;;  %v3276_v21 = vpop.eup %3275  ;;  %3295 = vpow2.f32 %v2877_v5  ;;  %2246 = vperm.xlu0 %3078, %v3270_v54   ;;  %v3918_v50 = vpop.f32.mrb[47].mxu0  ;;  %v2830_v31 = vmul.f32 -1.442695, %v986_v48  ;;  %v989_v54 = vadd.f32 %v3789_v7, %v375_v63 }
 0x150   : > { %v3920_v16 = vpop.f32.mrb[47].mxu1  ;;  %v3278_v14 = vpop.eup %3277  ;;  %3297 = vrcp.f32 %v1627_v40  ;;  %2011 = vperm.xlu1 %3077, %v3266_v22  }
 0x151   : > { %4324 = vst [vmem:[#allocation6_spill] sm:$0xff] %v3920_v16  ;;  %v3280_v57 = vpop.eup %3279  ;;  %3299 = vpow2.f32 %v2875_v3  ;;  %v2831_v20 = vmul.f32 -1.442695, %v989_v54  ;;  %v424_v3 = vld [vmem:[%s3680_s7 + $0x250] sm:$0xff] }
 0x152   : > { %v3282_v47 = vpop.eup %3281  ;;  %3301 = vpow2.f32 %v2832_v44  ;;  %v1625_v22 = vadd.f32 1.0, %v3280_v57  ;;  %v1186_v46 = vadd.f32 %v3775_v49, %v424_v3  ;;  %v422_v57 = vld [vmem:[%s3680_s7 + $0x240] sm:$0xff] }
 0x153   : > { %v3284_v5 = vpop.eup %3283  ;;  %2036 = vperm.xlu0 %3078, %v3274_v53   ;;  %3303 = vrcp.f32 %v1624_v29  ;;  %v1582_v0 = vadd.f32 1.0, %v3282_v47  ;;  %v425_v29 = vld [vmem:[%s3680_s7 + $0x258] sm:$0xff] }
 0x154   : > { %v3286_v30 = vpop.eup %3285  ;;  %2251 = vperm.xlu1 %3077, %v3272_v32   ;;  %3305 = vrcp.f32 %v1577_v26  ;;  %v1189_v54 = vadd.f32 %v3791_v8, %v425_v29  ;;  %v2880_v49 = vmul.f32 -1.442695, %v1186_v46  ;;  %v381_v8 = vld [vmem:[%s3680_s7 + $0xf8] sm:$0xff] }
 0x155   : > { %v3288_v4 = vpop.eup %3287  ;;  %3307 = vpow2.f32 %v2830_v31  ;;  %v1580_v16 = vadd.f32 1.0, %v3286_v30 }
 0x156   : > { %v3290_v40 = vpop.eup %3289  ;;  %3309 = vpow2.f32 %v2833_v1  ;;  %v1583_v44 = vadd.f32 1.0, %v3288_v4  ;;  %v380_v1 = vld [vmem:[%s3680_s7 + $0xf0] sm:$0xff]  ;;  %v378_v4 = vld [vmem:[%s3680_s7 + $0xe0] sm:$0xff] }
 0x157   : > { %v3292_v48 = vpop.eup %3291  ;;  %2276 = vperm.xlu0 %3078, %v3284_v5   ;;  %3311 = vrcp.f32 %v1582_v0  ;;  %v1630_v53 = vadd.f32 1.0, %v3290_v40  ;;  %v423_v5 = vld [vmem:[%s3680_s7 + $0x248] sm:$0xff]  ;;  %v1178_v0 = vadd.f32 %v3785_v2, %v422_v57  ;;  %v1010_v3 = vadd.f32 %v3803_v37, %v380_v1  ;;  %v429_v37 = vld [vmem:[%s3680_s7 + $0x278] sm:$0xff] }
 0x158   : > { %v3294_v7 = vpop.eup %3293  ;;  %2041 = vperm.xlu1 %3077, %v3278_v14   ;;  %3313 = vrcp.f32 %v1625_v22  ;;  %v1581_v63 = vadd.f32 1.0, %v3292_v48  ;;  %v1181_v40 = vadd.f32 %v3795_v12, %v423_v5  ;;  %v379_v48 = vld [vmem:[%s3680_s7 + $0xe8] sm:$0xff]  ;;  %v1002_v2 = vadd.f32 %v3809_v42, %v378_v4 }
 0x159   : > { %v3296_v32 = vpop.eup %3295  ;;  %3315 = vpow2.f32 %v2831_v20  ;;  %v1628_v47 = vadd.f32 1.0, %v3294_v7  ;;  %v1013_v12 = vadd.f32 %v3813_v52, %v381_v8 }
 0x15a   : > { %v3298_v31 = vpop.eup %3297  ;;  %3317 = vrcp.f32 %v1580_v16  ;;  %v1631_v14 = vadd.f32 1.0, %v3296_v32  ;;  %v2878_v32 = vmul.f32 -1.442695, %v1178_v0  ;;  %v2834_v42 = vmul.f32 -1.442695, %v1002_v2 }
 0x15b   : > { %v3300_v26 = vpop.eup %3299  ;;  %2026 = vperm.xlu0 %3078, %v3276_v21   ;;  %3319 = vrcp.f32 %v1630_v53  ;;  %v2881_v21 = vmul.f32 -1.442695, %v1189_v54  ;;  %v2837_v52 = vmul.f32 -1.442695, %v1013_v12 }
 0x15c   : > { %2281 = vperm.xlu1 %3077, %v3298_v31   ;;  %v3302_v30 = vpop.eup %3301  ;;  %3321 = vrcp.f32 %v1583_v44  ;;  %v1629_v16 = vadd.f32 1.0, %v3300_v26  ;;  %v428_v44 = vld [vmem:[%s3680_s7 + $0x270] sm:$0xff]  ;;  %v2879_v31 = vmul.f32 -1.442695, %v1181_v40  ;;  %v2836_v26 = vmul.f32 -1.442695, %v1010_v3 }
 0x15d   : > { %v3304_v22 = vpop.eup %3303  ;;  %3323 = vrcp.f32 %v1581_v63  ;;  %v1586_v53 = vadd.f32 1.0, %v3302_v30  ;;  %v1005_v63 = vadd.f32 %v3817_v51, %v379_v48  ;;  %v1202_v54 = vadd.f32 %v3805_v38, %v428_v44  ;;  %v426_v38 = vld [vmem:[%s3680_s7 + $0x260] sm:$0xff]  ;;  %v427_v40 = vld [vmem:[%s3680_s7 + $0x268] sm:$0xff] }
 0x15e   : > { %v3306_v20 = vpop.eup %3305  ;;  %3325 = vrcp.f32 %v1628_v47  ;;  %v1197_v2 = vadd.f32 %v3819_v62, %v427_v40  ;;  %v383_v40 = vld [vmem:[%s3680_s7 + $0x108] sm:$0xff] }
 0x15f   : > { %2266 = vperm.xlu0 %3078, %v3304_v22   ;;  %v3308_v7 = vpop.eup %3307  ;;  %3327 = vrcp.f32 %v1631_v14  ;;  %v1205_v14 = vadd.f32 %v3815_v45, %v429_v37  ;;  %v2835_v51 = vmul.f32 -1.442695, %v1005_v63  ;;  %v2884_v4 = vmul.f32 -1.442695, %v1202_v54  ;;  %v384_v45 = vld [vmem:[%s3680_s7 + $0x110] sm:$0xff] }
 0x160   : > { %2031 = vperm.xlu1 %3077, %v3306_v20   ;;  %v3310_v29 = vpop.eup %3309  ;;  %3329 = vpow2.f32 %v2880_v49  ;;  %v1584_v48 = vadd.f32 1.0, %v3308_v7  ;;  %v2883_v7 = vmul.f32 -1.442695, %v1197_v2  ;;  %v432_v54 = vld [vmem:[%s3680_s7 + $0x290] sm:$0xff]  ;;  %v431_v2 = vld [vmem:[%s3680_s7 + $0x288] sm:$0xff] }
 0x161   : > { %v3312_v46 = vpop.eup %3311  ;;  %3331 = vrcp.f32 %v1629_v16  ;;  %v1587_v49 = vadd.f32 1.0, %v3310_v29  ;;  %v2885_v16 = vmul.f32 -1.442695, %v1205_v14 }
 0x162   : > { %v3314_v57 = vpop.eup %3313  ;;  %3333 = vpow2.f32 %v2881_v21  ;;  %v1194_v21 = vadd.f32 %v3811_v43, %v426_v38  ;;  %v1218_v38 = vadd.f32 %v3830_v15, %v432_v54  ;;  %v1021_v15 = vadd.f32 %v3842_v24, %v383_v40 }
 0x163   : > { %2056 = vperm.xlu0 %3078, %v3312_v46   ;;  %v3316_v47 = vpop.eup %3315  ;;  %3335 = vrcp.f32 %v1586_v53 }
 0x164   : > { %2271 = vperm.xlu1 %3077, %v3314_v57   ;;  %v3318_v5 = vpop.eup %3317  ;;  %3337 = vpow2.f32 %v2878_v32  ;;  %v1026_v32 = vadd.f32 %v3828_v56, %v384_v45  ;;  %v1585_v44 = vadd.f32 1.0, %v3316_v47  ;;  %v2882_v63 = vmul.f32 -1.442695, %v1194_v21  ;;  %v385_v57 = vld [vmem:[%s3680_s7 + $0x118] sm:$0xff] }
 0x165   : > { %v3320_v1 = vpop.eup %3319  ;;  %3339 = vpow2.f32 %v2879_v31  ;;  %v1029_v14 = vadd.f32 %v3837_v23, %v385_v57  ;;  %v430_v23 = vld [vmem:[%s3680_s7 + $0x280] sm:$0xff]  ;;  %v436_v57 = vld [vmem:[%s3680_s7 + $0x2b0] sm:$0xff] }
 0x166   : > { %v3322_v30 = vpop.eup %3321  ;;  %3341 = vpow2.f32 %v2836_v26  ;;  %v2840_v62 = vmul.f32 -1.442695, %v1026_v32 }
 0x167   : > { %2296 = vperm.xlu0 %3078, %v3320_v1   ;;  %v3324_v0 = vpop.eup %3323  ;;  %3343 = vpow2.f32 %v2834_v42  ;;  %v2841_v45 = vmul.f32 -1.442695, %v1029_v14 }
 0x168   : > { %2061 = vperm.xlu1 %3077, %v3322_v30   ;;  %v3326_v22 = vpop.eup %3325  ;;  %3345 = vpow2.f32 %v2837_v52  ;;  %v433_v30 = vld [vmem:[%s3680_s7 + $0x298] sm:$0xff] }
 0x169   : > { %v3328_v8 = vpop.eup %3327  ;;  %3347 = vpow2.f32 %v2835_v51 }
 0x16a   : > { %v3330_v20 = vpop.eup %3329  ;;  %3349 = vrcp.f32 %v1587_v49 }
 0x16b   : > { %2046 = vperm.xlu0 %3078, %v3318_v5   ;;  %v3332_v3 = vpop.eup %3331  ;;  %v1634_v53 = vadd.f32 1.0, %v3330_v20  ;;  %3351 = vpow2.f32 %v2884_v4  ;;  %v382_v4 = vld [vmem:[%s3680_s7 + $0x100] sm:$0xff]  ;;  %v1221_v20 = vadd.f32 %v3839_v33, %v433_v30 }
 0x16c   : > { %2301 = vperm.xlu1 %3077, %v3328_v8   ;;  %v3334_v29 = vpop.eup %3333  ;;  %3353 = vpow2.f32 %v2885_v16 }
 0x16d   : > { %v3336_v12 = vpop.eup %3335  ;;  %3355 = vrcp.f32 %v1634_v53  ;;  %v1635_v46 = vadd.f32 1.0, %v3334_v29  ;;  %v2888_v53 = vmul.f32 -1.442695, %v1218_v38  ;;  %v2889_v33 = vmul.f32 -1.442695, %v1221_v20 }
 0x16e   : > { %v3338_v31 = vpop.eup %3337  ;;  %3357 = vrcp.f32 %v1584_v48 }
 0x16f   : > { %2286 = vperm.xlu0 %3078, %v3326_v22   ;;  %v3340_v43 = vpop.eup %3339  ;;  %3359 = vrcp.f32 %v1635_v46  ;;  %v1632_v56 = vadd.f32 1.0, %v3338_v31 }
 0x170   : > { %2051 = vperm.xlu1 %3077, %v3324_v0   ;;  %v3342_v37 = vpop.eup %3341  ;;  %3361 = vrcp.f32 %v1585_v44  ;;  %v1633_v47 = vadd.f32 1.0, %v3340_v43  ;;  %v388_v44 = vld [vmem:[%s3680_s7 + $0x130] sm:$0xff]  ;;  %v2839_v43 = vmul.f32 -1.442695, %v1021_v15 }
 0x171   : > { %v3344_v26 = vpop.eup %3343  ;;  %3363 = vpow2.f32 %v2882_v63  ;;  %v1590_v52 = vadd.f32 1.0, %v3342_v37  ;;  %v1213_v63 = vadd.f32 %v3844_v39, %v431_v2  ;;  %v389_v37 = vld [vmem:[%s3680_s7 + $0x138] sm:$0xff]  ;;  %v386_v39 = vld [vmem:[%s3680_s7 + $0x120] sm:$0xff] }
 0x172   : > { %v3346_v42 = vpop.eup %3345  ;;  %3365 = vpow2.f32 %v2883_v7  ;;  %v1588_v51 = vadd.f32 1.0, %v3344_v26  ;;  %v1042_v7 = vadd.f32 %v3847_v55, %v388_v44  ;;  %v1045_v54 = vadd.f32 %v3856_v11, %v389_v37  ;;  %v434_v11 = vld [vmem:[%s3680_s7 + $0x2a0] sm:$0xff] }
 0x173   : > { %2076 = vperm.xlu0 %3078, %v3336_v12   ;;  %v3348_v5 = vpop.eup %3347  ;;  %3367 = vpow2.f32 %v2840_v62  ;;  %v1591_v0 = vadd.f32 1.0, %v3346_v42  ;;  %v1210_v12 = vadd.f32 %v3834_v27, %v430_v23 }
 0x174   : > { %2291 = vperm.xlu1 %3077, %v3332_v3   ;;  %v3350_v1 = vpop.eup %3349  ;;  %3369 = vrcp.f32 %v1632_v56  ;;  %v1589_v16 = vadd.f32 1.0, %v3348_v5  ;;  %v1018_v3 = vadd.f32 %v3832_v13, %v382_v4  ;;  %v2844_v55 = vmul.f32 -1.442695, %v1042_v7 }
 0x175   : > { %v3352_v49 = vpop.eup %3351  ;;  %3371 = vrcp.f32 %v1633_v47  ;;  %v2886_v62 = vmul.f32 -1.442695, %v1210_v12  ;;  %v2887_v47 = vmul.f32 -1.442695, %v1213_v63  ;;  %v2845_v38 = vmul.f32 -1.442695, %v1045_v54 }
 0x176   : > { %v3354_v22 = vpop.eup %3353  ;;  %3373 = vrcp.f32 %v1590_v52  ;;  %v1638_v21 = vadd.f32 1.0, %v3352_v49  ;;  %v2838_v31 = vmul.f32 -1.442695, %v1018_v3  ;;  %v1234_v52 = vadd.f32 %v3849_v60, %v436_v57  ;;  %v435_v12 = vld [vmem:[%s3680_s7 + $0x2a8] sm:$0xff]  ;;  %v440_v54 = vld [vmem:[%s3680_s7 + $0x2d0] sm:$0xff] }
 0x177   : > { %v3356_v8 = vpop.eup %3355  ;;  %3375 = vrcp.f32 %v1588_v51  ;;  %v1639_v32 = vadd.f32 1.0, %v3354_v22  ;;  %v1034_v49 = vadd.f32 %v3852_v9, %v386_v39  ;;  %v1226_v9 = vadd.f32 %v3854_v61, %v434_v11 }
 0x178   : > { %2081 = vperm.xlu1 %3077, %v3350_v1   ;;  %2316 = vperm.xlu0 %3078, %v3356_v8   ;;  %v3358_v48 = vpop.eup %3357  ;;  %3377 = vrcp.f32 %v1591_v0  ;;  %v387_v0 = vld [vmem:[%s3680_s7 + $0x128] sm:$0xff]  ;;  %v1229_v37 = vadd.f32 %v3864_v36, %v435_v12 }
 0x179   : > { %v3360_v29 = vpop.eup %3359  ;;  %3379 = vrcp.f32 %v1589_v16  ;;  %v2892_v16 = vmul.f32 -1.442695, %v1234_v52  ;;  %v1037_v40 = vadd.f32 %v3862_v34, %v387_v0  ;;  %v2890_v61 = vmul.f32 -1.442695, %v1226_v9  ;;  %v1897_v12 = vld [vmem:[%s3981_s10 + $0x188] sm:$0xff] }
 0x17a   : > { %v3362_v46 = vpop.eup %3361  ;;  %3381 = vpow2.f32 %v2841_v45  ;;  %v2842_v45 = vmul.f32 -1.442695, %v1034_v49 }
 0x17b   : > { %v3364_v13 = vpop.eup %3363  ;;  %3383 = vrcp.f32 %v1638_v21 }
 0x17c   : > { %2321 = vperm.xlu1 %3077, %v3360_v29   ;;  %2066 = vperm.xlu0 %3078, %v3358_v48   ;;  %v3366_v24 = vpop.eup %3365  ;;  %3385 = vpow2.f32 %v2888_v53  ;;  %v1636_v56 = vadd.f32 1.0, %v3364_v13  ;;  %v437_v48 = vld [vmem:[%s3680_s7 + $0x2b8] sm:$0xff]  ;;  %v2843_v53 = vmul.f32 -1.442695, %v1037_v40  ;;  %v1850_v13 = vld [vmem:[%s3981_s10 + $0x10] sm:$0xff] }
 0x17d   : > { %v3368_v27 = vpop.eup %3367  ;;  %3387 = vrcp.f32 %v1639_v32  ;;  %v1637_v1 = vadd.f32 1.0, %v3366_v24  ;;  %v1237_v32 = vadd.f32 %v3858_v59, %v437_v48  ;;  %v1898_v24 = vld [vmem:[%s3981_s10 + $0x190] sm:$0xff] }
 0x17e   : > { %v3370_v26 = vpop.eup %3369  ;;  %3389 = vpow2.f32 %v2889_v33  ;;  %v1594_v30 = vadd.f32 1.0, %v3368_v27  ;;  %v392_v33 = vld [vmem:[%s3680_s7 + $0x150] sm:$0xff] }
 0x17f   : > { %v3372_v42 = vpop.eup %3371  ;;  %3391 = vpow2.f32 %v2838_v31  ;;  %v1058_v57 = vadd.f32 %v3876_v6, %v392_v33  ;;  %v2891_v6 = vmul.f32 -1.442695, %v1229_v37  ;;  %v1849_v33 = vld [vmem:[%s3981_s10 + $0x8] sm:$0xff] }
 0x180   : > { %2071 = vperm.xlu1 %3077, %v3362_v46   ;;  %2306 = vperm.xlu0 %3078, %v3370_v26   ;;  %v3374_v5 = vpop.eup %3373  ;;  %3393 = vpow2.f32 %v2839_v43 }
 0x181   : > { %v3376_v14 = vpop.eup %3375  ;;  %3395 = vpow2.f32 %v2886_v62  ;;  %v2893_v62 = vmul.f32 -1.442695, %v1237_v32  ;;  %v2848_v0 = vmul.f32 -1.442695, %v1058_v57  ;;  %v438_v32 = vld [vmem:[%s3680_s7 + $0x2c0] sm:$0xff] }
 0x182   : > { %v3378_v51 = vpop.eup %3377  ;;  %3397 = vrcp.f32 %v1636_v56  ;;  %v393_v56 = vld [vmem:[%s3680_s7 + $0x158] sm:$0xff] }
 0x183   : > { %v3380_v4 = vpop.eup %3379  ;;  %3399 = vpow2.f32 %v2887_v47 }
 0x184   : > { %2311 = vperm.xlu1 %3077, %v3372_v42   ;;  %2096 = vperm.xlu0 %3078, %v3374_v5   ;;  %v3382_v22 = vpop.eup %3381  ;;  %3401 = vpow2.f32 %v2844_v55  ;;  %v1851_v5 = vld [vmem:[%s3981_s10 + $0x18] sm:$0xff] }
 0x185   : > { %v3384_v60 = vpop.eup %3383  ;;  %3403 = vrcp.f32 %v1637_v1  ;;  %v1595_v20 = vadd.f32 1.0, %v3382_v22  ;;  %v1848_v1 = vld [vmem:[%s3981_s10] sm:$0xff] }
 0x186   : > { %v3386_v8 = vpop.eup %3385  ;;  %3405 = vrcp.f32 %v1594_v30  ;;  %v1061_v30 = vadd.f32 %v3889_v19, %v393_v56  ;;  %v1899_v19 = vld [vmem:[%s3981_s10 + $0x198] sm:$0xff]  ;;  %v4325_v56 = vld [vmem:[#allocation2_spill] sm:$0xff] }
 0x187   : > { %v3388_v23 = vpop.eup %3387  ;;  %3407 = vpow2.f32 %v2845_v38  ;;  %v1642_v3 = vadd.f32 1.0, %v3386_v8  ;;  %v1250_v38 = vadd.f32 %v3878_v28, %v440_v54 }
 0x188   : > { %2101 = vperm.xlu1 %3077, %v3378_v51   ;;  %2336 = vperm.xlu0 %3078, %v3384_v60   ;;  %v3390_v21 = vpop.eup %3389  ;;  %3409 = vpow2.f32 %v2892_v16  ;;  %v2849_v28 = vmul.f32 -1.442695, %v1061_v30  ;;  %v397_v30 = vld [vmem:[%s3680_s7 + $0x178] sm:$0xff] }
 0x189   : > { %v3392_v15 = vpop.eup %3391  ;;  %3411 = vpow2.f32 %v2842_v45  ;;  %v1643_v29 = vadd.f32 1.0, %v3390_v21  ;;  %v441_v45 = vld [vmem:[%s3680_s7 + $0x2d8] sm:$0xff] }
 0x18a   : > { %v3394_v34 = vpop.eup %3393  ;;  %3413 = vrcp.f32 %v1595_v20  ;;  %v1592_v46 = vadd.f32 1.0, %v3392_v15  ;;  %v1896_v20 = vld [vmem:[%s3981_s10 + $0x180] sm:$0xff]  ;;  %v2896_v15 = vmul.f32 -1.442695, %v1250_v38 }
 0x18b   : > { %v3396_v2 = vpop.eup %3395  ;;  %3415 = vrcp.f32 %v1642_v3  ;;  %v1593_v63 = vadd.f32 1.0, %v3394_v34 }
 0x18c   : > { %2341 = vperm.xlu1 %3077, %v3388_v23   ;;  %2086 = vperm.xlu0 %3078, %v3376_v14   ;;  %v3398_v44 = vpop.eup %3397  ;;  %3417 = vpow2.f32 %v2843_v53  ;;  %v1640_v7 = vadd.f32 1.0, %v3396_v2  ;;  %v390_v14 = vld [vmem:[%s3680_s7 + $0x140] sm:$0xff]  ;;  %v1253_v53 = vadd.f32 %v3891_v35, %v441_v45 }
 0x18d   : > { %v3400_v31 = vpop.eup %3399  ;;  %3419 = vpow2.f32 %v2890_v61  ;;  %v1050_v40 = vadd.f32 %v3883_v25, %v390_v14 }
 0x18e   : > { %v3402_v43 = vpop.eup %3401  ;;  %v1957_v59 = vpop.permute.xlu1 %1956  ;;  %3421 = vrcp.f32 %v1643_v29  ;;  %v1641_v47 = vadd.f32 1.0, %v3400_v31  ;;  %v439_v31 = vld [vmem:[%s3680_s7 + $0x2c8] sm:$0xff] }
 0x18f   : > { %v3404_v27 = vpop.eup %3403  ;;  %v2197_v36 = vpop.permute.xlu0 %2196  ;;  %v2426_v26 = vmul.f32 %v1957_v59, %v1850_v13  ;;  %3423 = vrcp.f32 %v1592_v46  ;;  %v1598_v52 = vadd.f32 1.0, %v3402_v43  ;;  %v2846_v29 = vmul.f32 -1.442695, %v1050_v40 }
 0x190   : > { %2091 = vperm.xlu1 %3077, %v3380_v4   ;;  %2326 = vperm.xlu0 %3078, %v3398_v44   ;;  %v3406_v42 = vpop.eup %3405  ;;  %v2474_v39 = vmul.f32 %v2197_v36, %v1898_v24  ;;  %3425 = vrcp.f32 %v1593_v63  ;;  %v391_v4 = vld [vmem:[%s3680_s7 + $0x148] sm:$0xff]  ;;  %v1242_v43 = vadd.f32 %v3885_v18, %v438_v32  ;;  %v1855_v36 = vld [vmem:[%s3981_s10 + $0x38] sm:$0xff]  ;;  %v1077_v40 = vadd.f32 %v3912_v58, %v397_v30 }
 0x191   : > { %v3408_v55 = vpop.eup %3407  ;;  %2523 = vst.msk [vmem:[%s3993_s13 + $0x10] sm:$0xff] %vm2520_vm1, %v2426_v26  ;;  %3427 = vrcp.f32 %v1640_v7  ;;  %v1053_v3 = vadd.f32 %v3894_v41, %v391_v4  ;;  %v2897_v7 = vmul.f32 -1.442695, %v1253_v53 }
 0x192   : > { %v3410_v51 = vpop.eup %3409  ;;  %2571 = vst.msk [vmem:[%s3993_s13 + $0x190] sm:$0xff] %vm2520_vm1, %v2474_v39  ;;  %v1962_v49 = vpop.permute.xlu1 %1961  ;;  %3429 = vpow2.f32 %v2893_v62  ;;  %v1599_v60 = vadd.f32 1.0, %v3408_v55  ;;  %v2853_v58 = vmul.f32 -1.442695, %v1077_v40 }
 0x193   : > { %v2427_v11 = vmul.f32 %v1962_v49, %v1851_v5  ;;  %v1947_v22 = vpop.permute.xlu0 %1946  ;;  %v3412_v16 = vpop.eup %3411  ;;  %3431 = vrcp.f32 %v1641_v47  ;;  %v1646_v23 = vadd.f32 1.0, %v3410_v51  ;;  %v2847_v35 = vmul.f32 -1.442695, %v1053_v3  ;;  %v1854_v47 = vld [vmem:[%s3981_s10 + $0x30] sm:$0xff] }
 0x194   : > { %2331 = vperm.xlu1 %3077, %v3404_v27   ;;  %2116 = vperm.xlu0 %3078, %v3406_v42   ;;  %v2424_v8 = vmul.f32 %v1947_v22, %v1848_v1  ;;  %v3414_v9 = vpop.eup %3413  ;;  %3433 = vrcp.f32 %v1598_v52  ;;  %v1596_v46 = vadd.f32 1.0, %v3412_v16  ;;  %v396_v27 = vld [vmem:[%s3680_s7 + $0x170] sm:$0xff]  ;;  %v1245_v42 = vadd.f32 %v4325_v56, %v439_v31  ;;  %v394_v52 = vld [vmem:[%s3680_s7 + $0x160] sm:$0xff] }
 0x195   : > { %2524 = vst.msk [vmem:[%s3993_s13 + $0x18] sm:$0xff] %vm2520_vm1, %v2427_v11  ;;  %v3416_v21 = vpop.eup %3415  ;;  %3435 = vpow2.f32 %v2891_v6  ;;  %v1074_v5 = vadd.f32 %v3903_v10, %v396_v27  ;;  %v2894_v1 = vmul.f32 -1.442695, %v1242_v43  ;;  %v1066_v10 = vadd.f32 %v3907_v17, %v394_v52  ;;  %v1902_v22 = vld [vmem:[%s3981_s10 + $0x1b0] sm:$0xff]  ;;  %v1900_v31 = vld [vmem:[%s3981_s10 + $0x1a0] sm:$0xff]  ;;  %v1853_v27 = vld [vmem:[%s3981_s10 + $0x28] sm:$0xff] }
 0x196   : > { %2521 = vst.msk [vmem:[%s3993_s13] sm:$0xff] %vm2520_vm1, %v2424_v8  ;;  %v2202_v25 = vpop.permute.xlu1 %2201  ;;  %v3418_v48 = vpop.eup %3417  ;;  %3437 = vpow2.f32 %v2848_v0  ;;  %v2895_v11 = vmul.f32 -1.442695, %v1245_v42  ;;  %v445_v42 = vld [vmem:[%s3680_s7 + $0x2f8] sm:$0xff] }
 0x197   : > { %v2475_v34 = vmul.f32 %v2202_v25, %v1899_v19  ;;  %v2187_v61 = vpop.permute.xlu0 %2186  ;;  %v3420_v2 = vpop.eup %3419  ;;  %3439 = vrcp.f32 %v1599_v60  ;;  %v1597_v39 = vadd.f32 1.0, %v3418_v48  ;;  %v2852_v60 = vmul.f32 -1.442695, %v1074_v5  ;;  %v395_v19 = vld [vmem:[%s3680_s7 + $0x168] sm:$0xff]  ;;  %v1852_v25 = vld [vmem:[%s3981_s10 + $0x20] sm:$0xff]  ;;  %v1858_v5 = vld [vmem:[%s3981_s10 + $0x50] sm:$0xff] }
 0x198   : > { %2121 = vperm.xlu1 %3077, %v3414_v9   ;;  %2356 = vperm.xlu0 %3078, %v3416_v21   ;;  %v2472_v41 = vmul.f32 %v2187_v61, %v1896_v20  ;;  %v3422_v44 = vpop.eup %3421  ;;  %3441 = vrcp.f32 %v1646_v23  ;;  %v1644_v0 = vadd.f32 1.0, %v3420_v2  ;;  %v442_v21 = vld [vmem:[%s3680_s7 + $0x2e0] sm:$0xff]  ;;  %v2850_v3 = vmul.f32 -1.442695, %v1066_v10  ;;  %v1903_v61 = vld [vmem:[%s3981_s10 + $0x1b8] sm:$0xff]  ;;  %v444_v2 = vld [vmem:[%s3680_s7 + $0x2f0] sm:$0xff] }
 0x199   : > { %2572 = vst.msk [vmem:[%s3993_s13 + $0x198] sm:$0xff] %vm2520_vm1, %v2475_v34  ;;  %v3424_v13 = vpop.eup %3423  ;;  %3443 = vpow2.f32 %v2849_v28 }
 0x19a   : > { %2569 = vst.msk [vmem:[%s3993_s13 + $0x180] sm:$0xff] %vm2520_vm1, %v2472_v41  ;;  %v2192_v63 = vpop.permute.xlu1 %2191  ;;  %v3426_v24 = vpop.eup %3425  ;;  %3445 = vpow2.f32 %v2896_v15  ;;  %v1069_v15 = vadd.f32 %v3918_v50, %v395_v19 }
 0x19b   : > { %v2473_v37 = vmul.f32 %v2192_v63, %v1897_v12  ;;  %v1952_v59 = vpop.permute.xlu0 %1951  ;;  %v3428_v62 = vpop.eup %3427  ;;  %3447 = vpow2.f32 %v2846_v29  ;;  %v4326_v29 = vld [vmem:[#allocation4_spill] sm:$0xff] }
 0x19c   : > { %2361 = vperm.xlu1 %3077, %v3422_v44   ;;  %2106 = vperm.xlu0 %3078, %v3424_v13   ;;  %v2425_v57 = vmul.f32 %v1952_v59, %v1849_v33  ;;  %v3430_v26 = vpop.eup %3429  ;;  %3449 = vrcp.f32 %v1596_v46  ;;  %v1258_v32 = vadd.f32 %v4326_v29, %v442_v21  ;;  %v443_v33 = vld [vmem:[%s3680_s7 + $0x2e8] sm:$0xff] }
 0x19d   : > { %2570 = vst.msk [vmem:[%s3993_s13 + $0x188] sm:$0xff] %vm2520_vm1, %v2473_v37  ;;  %v3432_v18 = vpop.eup %3431  ;;  %v1647_v54 = vadd.f32 1.0, %v3430_v26  ;;  %3451 = vpow2.f32 %v2847_v35 }
 0x19e   : > { %2522 = vst.msk [vmem:[%s3993_s13 + $0x8] sm:$0xff] %vm2520_vm1, %v2425_v57  ;;  %v1982_v55 = vpop.permute.xlu1 %1981  ;;  %v3434_v14 = vpop.eup %3433  ;;  %3453 = vpow2.f32 %v2897_v7  ;;  %v4327_v7 = vld [vmem:[#allocation3_spill] sm:$0xff]  ;;  %v2898_v59 = vmul.f32 -1.442695, %v1258_v32 }
 0x19f   : > { %v2431_v51 = vmul.f32 %v1982_v55, %v1855_v36  ;;  %v1977_v6 = vpop.permute.xlu0 %1976  ;;  %v3436_v49 = vpop.eup %3435  ;;  %3455 = vrcp.f32 %v1647_v54  ;;  %v1266_v37 = vadd.f32 %v4327_v7, %v444_v2 }
 0x1a0   : > { %2111 = vperm.xlu1 %3077, %v3426_v24   ;;  %2346 = vperm.xlu0 %3078, %v3428_v62   ;;  %v2430_v4 = vmul.f32 %v1977_v6, %v1854_v47  ;;  %v3438_v38 = vpop.eup %3437  ;;  %3457 = vrcp.f32 %v1597_v39  ;;  %v1645_v45 = vadd.f32 1.0, %v3436_v49  ;;  %v2851_v24 = vmul.f32 -1.442695, %v1069_v15  ;;  %v4328_v62 = vld [vmem:[#allocation6_spill] sm:$0xff]  ;;  %v1901_v49 = vld [vmem:[%s3981_s10 + $0x1a8] sm:$0xff] }
 0x1a1   : > { %2528 = vst.msk [vmem:[%s3993_s13 + $0x38] sm:$0xff] %vm2520_vm1, %v2431_v51  ;;  %v3440_v16 = vpop.eup %3439  ;;  %3459 = vpow2.f32 %v2894_v1  ;;  %v1602_v17 = vadd.f32 1.0, %v3438_v38  ;;  %v1261_v57 = vadd.f32 %v4328_v62, %v443_v33  ;;  %v2900_v52 = vmul.f32 -1.442695, %v1266_v37  ;;  %v4329_v51 = vld [vmem:[#allocation5_spill] sm:$0xff] }
 0x1a2   : > { %2527 = vst.msk [vmem:[%s3993_s13 + $0x30] sm:$0xff] %vm2520_vm1, %v2430_v4  ;;  %v3442_v8 = vpop.eup %3441  ;;  %3461 = vrcp.f32 %v1644_v0  ;;  %v1269_v6 = vadd.f32 %v4329_v51, %v445_v42 }
 0x1a3   : > { %v2217_v9 = vpop.permute.xlu0 %2216  ;;  %v3444_v23 = vpop.eup %3443  ;;  %3463 = vpow2.f32 %v2895_v11  ;;  %v2899_v30 = vmul.f32 -1.442695, %v1261_v57 }
 0x1a4   : > { %2351 = vperm.xlu1 %3077, %v3432_v18   ;;  %2136 = vperm.xlu0 %3078, %v3434_v14   ;;  %v2478_v20 = vmul.f32 %v2217_v9, %v1902_v22  ;;  %v3446_v28 = vpop.eup %3445  ;;  %3465 = vpow2.f32 %v2852_v60  ;;  %v1603_v34 = vadd.f32 1.0, %v3444_v23  ;;  %v2901_v19 = vmul.f32 -1.442695, %v1269_v6  ;;  %v1859_v9 = vld [vmem:[%s3981_s10 + $0x58] sm:$0xff] }
 0x1a5   : > { %v3448_v48 = vpop.eup %3447  ;;  %3467 = vrcp.f32 %v1645_v45  ;;  %v1650_v44 = vadd.f32 1.0, %v3446_v28 }
 0x1a6   : > { %2575 = vst.msk [vmem:[%s3993_s13 + $0x1b0] sm:$0xff] %vm2520_vm1, %v2478_v20  ;;  %v3450_v53 = vpop.eup %3449  ;;  %3469 = vrcp.f32 %v1602_v17  ;;  %v1600_v13 = vadd.f32 1.0, %v3448_v48 }
 0x1a7   : > { %v1967_v41 = vpop.permute.xlu0 %1966  ;;  %v3452_v12 = vpop.eup %3451  ;;  %3471 = vpow2.f32 %v2850_v3 }
 0x1a8   : > { %2141 = vperm.xlu1 %3077, %v3440_v16   ;;  %2376 = vperm.xlu0 %3078, %v3442_v8   ;;  %v2428_v46 = vmul.f32 %v1967_v41, %v1852_v25  ;;  %v3454_v50 = vpop.eup %3453  ;;  %3473 = vpow2.f32 %v2853_v58  ;;  %v1601_v39 = vadd.f32 1.0, %v3452_v12  ;;  %v1906_v16 = vld [vmem:[%s3981_s10 + $0x1d0] sm:$0xff]  ;;  %v1856_v25 = vld [vmem:[%s3981_s10 + $0x40] sm:$0xff] }
 0x1a9   : > { %v3456_v63 = vpop.eup %3455  ;;  %3475 = vrcp.f32 %v1603_v34  ;;  %v1651_v56 = vadd.f32 1.0, %v3454_v50  ;;  %v1907_v34 = vld [vmem:[%s3981_s10 + $0x1d8] sm:$0xff] }
 0x1aa   : > { %v2222_v35 = vpop.permute.xlu1 %2221  ;;  %2525 = vst.msk [vmem:[%s3993_s13 + $0x20] sm:$0xff] %vm2520_vm1, %v2428_v46  ;;  %v3458_v26 = vpop.eup %3457  ;;  %3477 = vrcp.f32 %v1650_v44  ;;  %v1904_v44 = vld [vmem:[%s3981_s10 + $0x1c0] sm:$0xff] }
 0x1ab   : > { %v2479_v43 = vmul.f32 %v2222_v35, %v1903_v61  ;;  %v3460_v18 = vpop.eup %3459  ;;  %3479 = vrcp.f32 %v1600_v13  ;;  %v1857_v35 = vld [vmem:[%s3981_s10 + $0x48] sm:$0xff] }
 0x1ac   : > { %2381 = vperm.xlu1 %3077, %v3456_v63   ;;  %2126 = vperm.xlu0 %3078, %v3450_v53   ;;  %v2207_v36 = vpop.permute.xlu0 %2206  ;;  %v3462_v55 = vpop.eup %3461  ;;  %3481 = vpow2.f32 %v2851_v24  ;;  %v1648_v38 = vadd.f32 1.0, %v3460_v18 }
 0x1ad   : > { %2576 = vst.msk [vmem:[%s3993_s13 + $0x1b8] sm:$0xff] %vm2520_vm1, %v2479_v43  ;;  %v2476_v47 = vmul.f32 %v2207_v36, %v1900_v31  ;;  %v3464_v1 = vpop.eup %3463  ;;  %3483 = vpow2.f32 %v2898_v59  ;;  %v1862_v59 = vld [vmem:[%s3981_s10 + $0x70] sm:$0xff]  ;;  %v1905_v36 = vld [vmem:[%s3981_s10 + $0x1c8] sm:$0xff] }
 0x1ae   : > { %v1972_v54 = vpop.permute.xlu1 %1971  ;;  %v3466_v4 = vpop.eup %3465  ;;  %3485 = vrcp.f32 %v1651_v56  ;;  %v1649_v40 = vadd.f32 1.0, %v3464_v1 }
 0x1af   : > { %v2429_v14 = vmul.f32 %v1972_v54, %v1853_v27  ;;  %2573 = vst.msk [vmem:[%s3993_s13 + $0x1a0] sm:$0xff] %vm2520_vm1, %v2476_v47  ;;  %v3468_v10 = vpop.eup %3467  ;;  %3487 = vrcp.f32 %v1601_v39  ;;  %v1606_v20 = vadd.f32 1.0, %v3466_v4  ;;  %v1860_v4 = vld [vmem:[%s3981_s10 + $0x60] sm:$0xff] }
 0x1b0   : > { %2131 = vperm.xlu1 %3077, %v3458_v26   ;;  %2366 = vperm.xlu0 %3078, %v3462_v55   ;;  %v1997_v0 = vpop.permute.xlu0 %1996  ;;  %v3470_v60 = vpop.eup %3469  ;;  %3489 = vpow2.f32 %v2900_v52  ;;  %v1910_v55 = vld [vmem:[%s3981_s10 + $0x1f0] sm:$0xff]  ;;  %v1863_v52 = vld [vmem:[%s3981_s10 + $0x78] sm:$0xff] }
 0x1b1   : > { %2526 = vst.msk [vmem:[%s3993_s13 + $0x28] sm:$0xff] %vm2520_vm1, %v2429_v14  ;;  %v2434_v11 = vmul.f32 %v1997_v0, %v1858_v5  ;;  %v3472_v45 = vpop.eup %3471  ;;  %3491 = vpow2.f32 %v2899_v30 }
 0x1b2   : > { %v2212_v22 = vpop.permute.xlu1 %2211  ;;  %v3474_v17 = vpop.eup %3473  ;;  %3493 = vrcp.f32 %v1648_v38  ;;  %v1604_v53 = vadd.f32 1.0, %v3472_v45  ;;  %v1911_v38 = vld [vmem:[%s3981_s10 + $0x1f8] sm:$0xff]  ;;  %v1861_v45 = vld [vmem:[%s3981_s10 + $0x68] sm:$0xff] }
 0x1b3   : > { %v2477_v8 = vmul.f32 %v2212_v22, %v1901_v49  ;;  %2531 = vst.msk [vmem:[%s3993_s13 + $0x50] sm:$0xff] %vm2520_vm1, %v2434_v11  ;;  %v3476_v28 = vpop.eup %3475  ;;  %3495 = vrcp.f32 %v1649_v40  ;;  %v1607_v29 = vadd.f32 1.0, %v3474_v17 }
 0x1b4   : > { %2371 = vperm.xlu1 %3077, %v3468_v10   ;;  %2156 = vperm.xlu0 %3078, %v3470_v60   ;;  %v2237_v23 = vpop.permute.xlu0 %2236  ;;  %v3478_v48 = vpop.eup %3477  ;;  %3497 = vpow2.f32 %v2901_v19 }
 0x1b5   : > { %2574 = vst.msk [vmem:[%s3993_s13 + $0x1a8] sm:$0xff] %vm2520_vm1, %v2477_v8  ;;  %v2482_v21 = vmul.f32 %v2237_v23, %v1906_v16  ;;  %v3480_v15 = vpop.eup %3479  ;;  %3499 = vrcp.f32 %v1606_v20  ;;  %v1908_v8 = vld [vmem:[%s3981_s10 + $0x1e0] sm:$0xff] }
 0x1b6   : > { %v2002_v3 = vpop.permute.xlu1 %2001  ;;  %v3482_v2 = vpop.eup %3481  ;;  %3501 = vrcp.f32 %v1604_v53 }
 0x1b7   : > { %v2435_v58 = vmul.f32 %v2002_v3, %v1859_v9  ;;  %2579 = vst.msk [vmem:[%s3993_s13 + $0x1d0] sm:$0xff] %vm2520_vm1, %v2482_v21  ;;  %v3484_v41 = vpop.eup %3483  ;;  %v1605_v13 = vadd.f32 1.0, %v3482_v2  ;;  %3503 = vrcp.f32 %v1607_v29  ;;  %v1909_v3 = vld [vmem:[%s3981_s10 + $0x1e8] sm:$0xff] }
 0x1b8   : > { %2161 = vperm.xlu1 %3077, %v3476_v28   ;;  %2396 = vperm.xlu0 %3078, %v3478_v48   ;;  %v1987_v61 = vpop.permute.xlu0 %1986  ;;  %v3486_v46 = vpop.eup %3485  ;;  %v1652_v24 = vadd.f32 1.0, %v3484_v41  ;;  %v1866_v28 = vld [vmem:[%s3981_s10 + $0x90] sm:$0xff] }
 0x1b9   : > { %2532 = vst.msk [vmem:[%s3993_s13 + $0x58] sm:$0xff] %vm2520_vm1, %v2435_v58  ;;  %v2432_v32 = vmul.f32 %v1987_v61, %v1856_v25  ;;  %v3488_v50 = vpop.eup %3487  ;;  %3505 = vrcp.f32 %v1605_v13  ;;  %v1867_v61 = vld [vmem:[%s3981_s10 + $0x98] sm:$0xff] }
 0x1ba   : > { %v2242_v12 = vpop.permute.xlu1 %2241  ;;  %v3490_v63 = vpop.eup %3489  ;;  %3507 = vrcp.f32 %v1652_v24 }
 0x1bb   : > { %v2483_v33 = vmul.f32 %v2242_v12, %v1907_v34  ;;  %2529 = vst.msk [vmem:[%s3993_s13 + $0x40] sm:$0xff] %vm2520_vm1, %v2432_v32  ;;  %v3492_v7 = vpop.eup %3491  ;;  %v1654_v57 = vadd.f32 1.0, %v3490_v63  ;;  %v1914_v34 = vld [vmem:[%s3981_s10 + $0x210] sm:$0xff]  ;;  %v1864_v12 = vld [vmem:[%s3981_s10 + $0x80] sm:$0xff] }
 0x1bc   : > { %2401 = vperm.xlu1 %3077, %v3486_v46   ;;  %2146 = vperm.xlu0 %3078, %v3480_v15   ;;  %v2227_v31 = vpop.permute.xlu0 %2226  ;;  %v3494_v27 = vpop.eup %3493  ;;  %v1653_v42 = vadd.f32 1.0, %v3492_v7 }
 0x1bd   : > { %2580 = vst.msk [vmem:[%s3993_s13 + $0x1d8] sm:$0xff] %vm2520_vm1, %v2483_v33  ;;  %v2480_v43 = vmul.f32 %v2227_v31, %v1904_v44  ;;  %v3496_v56 = vpop.eup %3495  ;;  %3509 = vrcp.f32 %v1654_v57  ;;  %v1915_v44 = vld [vmem:[%s3981_s10 + $0x218] sm:$0xff]  ;;  %v1865_v31 = vld [vmem:[%s3981_s10 + $0x88] sm:$0xff] }
 0x1be   : > { %v1992_v37 = vpop.permute.xlu1 %1991  ;;  %v3498_v18 = vpop.eup %3497  ;;  %3511 = vrcp.f32 %v1653_v42 }
 0x1bf   : > { %v2433_v62 = vmul.f32 %v1992_v37, %v1857_v35  ;;  %2577 = vst.msk [vmem:[%s3993_s13 + $0x1c0] sm:$0xff] %vm2520_vm1, %v2480_v43  ;;  %v3500_v54 = vpop.eup %3499  ;;  %v1655_v14 = vadd.f32 1.0, %v3498_v18  ;;  %v1912_v35 = vld [vmem:[%s3981_s10 + $0x200] sm:$0xff]  ;;  %v1870_v37 = vld [vmem:[%s3981_s10 + $0xb0] sm:$0xff] }
 0x1c0   : > { %2151 = vperm.xlu1 %3077, %v3488_v50   ;;  %2386 = vperm.xlu0 %3078, %v3494_v27   ;;  %v2017_v26 = vpop.permute.xlu0 %2016  ;;  %v3502_v51 = vpop.eup %3501 }
 0x1c1   : > { %2530 = vst.msk [vmem:[%s3993_s13 + $0x48] sm:$0xff] %vm2520_vm1, %v2433_v62  ;;  %v2438_v47 = vmul.f32 %v2017_v26, %v1862_v59  ;;  %v3504_v49 = vpop.eup %3503  ;;  %3513 = vrcp.f32 %v1655_v14  ;;  %v1913_v59 = vld [vmem:[%s3981_s10 + $0x208] sm:$0xff]  ;;  %v1918_v26 = vld [vmem:[%s3981_s10 + $0x230] sm:$0xff] }
 0x1c2   : > { %v2232_v39 = vpop.permute.xlu1 %2231 }
 0x1c3   : > { %v2481_v5 = vmul.f32 %v2232_v39, %v1905_v36  ;;  %2535 = vst.msk [vmem:[%s3993_s13 + $0x70] sm:$0xff] %vm2520_vm1, %v2438_v47  ;;  %v3506_v10 = vpop.eup %3505 }
 0x1c4   : > { %2391 = vperm.xlu1 %3077, %v3496_v56   ;;  %2176 = vperm.xlu0 %3078, %v3500_v54   ;;  %v3508_v60 = vpop.eup %3507  ;;  %v1871_v56 = vld [vmem:[%s3981_s10 + $0xb8] sm:$0xff]  ;;  %v1868_v54 = vld [vmem:[%s3981_s10 + $0xa0] sm:$0xff] }
 0x1c5   : > { %2578 = vst.msk [vmem:[%s3993_s13 + $0x1c8] sm:$0xff] %vm2520_vm1, %v2481_v5  ;;  %v1919_v5 = vld [vmem:[%s3981_s10 + $0x238] sm:$0xff] }
 0x1c6   : > { %v2257_v1 = vpop.permute.xlu0 %2256 }
 0x1c7   : > { %v2022_v6 = vpop.permute.xlu1 %2021  ;;  %v2486_v30 = vmul.f32 %v2257_v1, %v1910_v55  ;;  %v3510_v9 = vpop.eup %3509 }
 0x1c8   : > { %v2439_v0 = vmul.f32 %v2022_v6, %v1863_v52  ;;  %2181 = vperm.xlu1 %3077, %v3504_v49   ;;  %2166 = vperm.xlu0 %3078, %v3502_v51   ;;  %v3512_v20 = vpop.eup %3511  ;;  %v1916_v51 = vld [vmem:[%s3981_s10 + $0x220] sm:$0xff]  ;;  %v1869_v6 = vld [vmem:[%s3981_s10 + $0xa8] sm:$0xff] }
 0x1c9   : > { %2583 = vst.msk [vmem:[%s3993_s13 + $0x1f0] sm:$0xff] %vm2520_vm1, %v2486_v30 }
 0x1ca   : > { %2536 = vst.msk [vmem:[%s3993_s13 + $0x78] sm:$0xff] %vm2520_vm1, %v2439_v0  ;;  %v2007_v11 = vpop.permute.xlu0 %2006 }
 0x1cb   : > { %v2262_v22 = vpop.permute.xlu1 %2261  ;;  %v2436_v16 = vmul.f32 %v2007_v11, %v1860_v4  ;;  %v3514_v15 = vpop.eup %3513  ;;  %v1917_v11 = vld [vmem:[%s3981_s10 + $0x228] sm:$0xff] }
 0x1cc   : > { %v2487_v40 = vmul.f32 %v2262_v22, %v1911_v38  ;;  %2171 = vperm.xlu1 %3077, %v3506_v10   ;;  %2406 = vperm.xlu0 %3078, %v3508_v60   ;;  %v1874_v38 = vld [vmem:[%s3981_s10 + $0xd0] sm:$0xff] }
 0x1cd   : > { %2533 = vst.msk [vmem:[%s3993_s13 + $0x60] sm:$0xff] %vm2520_vm1, %v2436_v16 }
 0x1ce   : > { %2584 = vst.msk [vmem:[%s3993_s13 + $0x1f8] sm:$0xff] %vm2520_vm1, %v2487_v40  ;;  %v2247_v19 = vpop.permute.xlu0 %2246  ;;  %v1875_v40 = vld [vmem:[%s3981_s10 + $0xd8] sm:$0xff] }
 0x1cf   : > { %v2012_v23 = vpop.permute.xlu1 %2011  ;;  %v2484_v17 = vmul.f32 %v2247_v19, %v1908_v8  ;;  %v1922_v8 = vld [vmem:[%s3981_s10 + $0x250] sm:$0xff] }
 0x1d0   : > { %v2437_v21 = vmul.f32 %v2012_v23, %v1861_v45  ;;  %2411 = vperm.xlu1 %3077, %v3512_v20   ;;  %2416 = vperm.xlu0 %3078, %v3510_v9   ;;  %v1923_v23 = vld [vmem:[%s3981_s10 + $0x258] sm:$0xff]  ;;  %v1872_v20 = vld [vmem:[%s3981_s10 + $0xc0] sm:$0xff] }
 0x1d1   : > { %2581 = vst.msk [vmem:[%s3993_s13 + $0x1e0] sm:$0xff] %vm2520_vm1, %v2484_v17 }
 0x1d2   : > { %2534 = vst.msk [vmem:[%s3993_s13 + $0x68] sm:$0xff] %vm2520_vm1, %v2437_v21  ;;  %v2037_v25 = vpop.permute.xlu0 %2036 }
 0x1d3   : > { %v2252_v48 = vpop.permute.xlu1 %2251  ;;  %v2442_v58 = vmul.f32 %v2037_v25, %v1866_v28  ;;  %v1873_v25 = vld [vmem:[%s3981_s10 + $0xc8] sm:$0xff] }
 0x1d4   : > { %v2485_v53 = vmul.f32 %v2252_v48, %v1909_v3  ;;  %2421 = vperm.xlu1 %3077, %v3514_v15  }
 0x1d5   : > { %2539 = vst.msk [vmem:[%s3993_s13 + $0x90] sm:$0xff] %vm2520_vm1, %v2442_v58  ;;  %v1920_v58 = vld [vmem:[%s3981_s10 + $0x240] sm:$0xff] }
 0x1d6   : > { %2582 = vst.msk [vmem:[%s3993_s13 + $0x1e8] sm:$0xff] %vm2520_vm1, %v2485_v53  ;;  %v2277_v2 = vpop.permute.xlu0 %2276 }
 0x1d7   : > { %v2042_v29 = vpop.permute.xlu1 %2041  ;;  %v2490_v32 = vmul.f32 %v2277_v2, %v1914_v34 }
 0x1d8   : > { %v2443_v41 = vmul.f32 %v2042_v29, %v1867_v61  ;;  %v1921_v61 = vld [vmem:[%s3981_s10 + $0x248] sm:$0xff]  ;;  %v1878_v29 = vld [vmem:[%s3981_s10 + $0xf0] sm:$0xff] }
 0x1d9   : > { %2587 = vst.msk [vmem:[%s3993_s13 + $0x210] sm:$0xff] %vm2520_vm1, %v2490_v32 }
 0x1da   : > { %2540 = vst.msk [vmem:[%s3993_s13 + $0x98] sm:$0xff] %vm2520_vm1, %v2443_v41  ;;  %v2027_v46 = vpop.permute.xlu0 %2026 }
 0x1db   : > { %v2282_v33 = vpop.permute.xlu1 %2281  ;;  %v2440_v50 = vmul.f32 %v2027_v46, %v1864_v12 }
 0x1dc   : > { %v2491_v13 = vmul.f32 %v2282_v33, %v1915_v44  ;;  %v1879_v44 = vld [vmem:[%s3981_s10 + $0xf8] sm:$0xff]  ;;  %v1926_v33 = vld [vmem:[%s3981_s10 + $0x270] sm:$0xff] }
 0x1dd   : > { %2537 = vst.msk [vmem:[%s3993_s13 + $0x80] sm:$0xff] %vm2520_vm1, %v2440_v50 }
 0x1de   : > { %2588 = vst.msk [vmem:[%s3993_s13 + $0x218] sm:$0xff] %vm2520_vm1, %v2491_v13  ;;  %v2267_v63 = vpop.permute.xlu0 %2266 }
 0x1df   : > { %v2032_v24 = vpop.permute.xlu1 %2031  ;;  %v2488_v43 = vmul.f32 %v2267_v63, %v1912_v35 }
 0x1e0   : > { %v2441_v7 = vmul.f32 %v2032_v24, %v1865_v31  ;;  %v1927_v31 = vld [vmem:[%s3981_s10 + $0x278] sm:$0xff]  ;;  %v1876_v24 = vld [vmem:[%s3981_s10 + $0xe0] sm:$0xff] }
 0x1e1   : > { %2585 = vst.msk [vmem:[%s3993_s13 + $0x200] sm:$0xff] %vm2520_vm1, %v2488_v43 }
 0x1e2   : > { %2538 = vst.msk [vmem:[%s3993_s13 + $0x88] sm:$0xff] %vm2520_vm1, %v2441_v7  ;;  %v2057_v27 = vpop.permute.xlu0 %2056 }
 0x1e3   : > { %v2272_v62 = vpop.permute.xlu1 %2271  ;;  %v2446_v57 = vmul.f32 %v2057_v27, %v1870_v37 }
 0x1e4   : > { %v2489_v36 = vmul.f32 %v2272_v62, %v1913_v59  ;;  %v1877_v59 = vld [vmem:[%s3981_s10 + $0xe8] sm:$0xff]  ;;  %v1924_v62 = vld [vmem:[%s3981_s10 + $0x260] sm:$0xff] }
 0x1e5   : > { %2543 = vst.msk [vmem:[%s3993_s13 + $0xb0] sm:$0xff] %vm2520_vm1, %v2446_v57 }
 0x1e6   : > { %2586 = vst.msk [vmem:[%s3993_s13 + $0x208] sm:$0xff] %vm2520_vm1, %v2489_v36  ;;  %v2297_v42 = vpop.permute.xlu0 %2296 }
 0x1e7   : > { %v2062_v47 = vpop.permute.xlu1 %2061  ;;  %v2494_v18 = vmul.f32 %v2297_v42, %v1918_v26 }
 0x1e8   : > { %v2447_v39 = vmul.f32 %v2062_v47, %v1871_v56  ;;  %v1925_v56 = vld [vmem:[%s3981_s10 + $0x268] sm:$0xff]  ;;  %v1882_v47 = vld [vmem:[%s3981_s10 + $0x110] sm:$0xff] }
 0x1e9   : > { %2591 = vst.msk [vmem:[%s3993_s13 + $0x230] sm:$0xff] %vm2520_vm1, %v2494_v18 }
 0x1ea   : > { %2544 = vst.msk [vmem:[%s3993_s13 + $0xb8] sm:$0xff] %vm2520_vm1, %v2447_v39  ;;  %v2047_v55 = vpop.permute.xlu0 %2046 }
 0x1eb   : > { %v2302_v52 = vpop.permute.xlu1 %2301  ;;  %v2444_v14 = vmul.f32 %v2047_v55, %v1868_v54 }
 0x1ec   : > { %v2495_v1 = vmul.f32 %v2302_v52, %v1919_v5  ;;  %v1883_v5 = vld [vmem:[%s3981_s10 + $0x118] sm:$0xff]  ;;  %v1930_v52 = vld [vmem:[%s3981_s10 + $0x290] sm:$0xff] }
 0x1ed   : > { %2541 = vst.msk [vmem:[%s3993_s13 + $0xa0] sm:$0xff] %vm2520_vm1, %v2444_v14 }
 0x1ee   : > { %2592 = vst.msk [vmem:[%s3993_s13 + $0x238] sm:$0xff] %vm2520_vm1, %v2495_v1  ;;  %v2287_v30 = vpop.permute.xlu0 %2286 }
 0x1ef   : > { %v2052_v49 = vpop.permute.xlu1 %2051  ;;  %v2492_v0 = vmul.f32 %v2287_v30, %v1916_v51 }
 0x1f0   : > { %v2445_v4 = vmul.f32 %v2052_v49, %v1869_v6  ;;  %v1931_v6 = vld [vmem:[%s3981_s10 + $0x298] sm:$0xff]  ;;  %v1880_v49 = vld [vmem:[%s3981_s10 + $0x100] sm:$0xff] }
 0x1f1   : > { %2589 = vst.msk [vmem:[%s3993_s13 + $0x220] sm:$0xff] %vm2520_vm1, %v2492_v0 }
 0x1f2   : > { %2542 = vst.msk [vmem:[%s3993_s13 + $0xa8] sm:$0xff] %vm2520_vm1, %v2445_v4  ;;  %v2077_v10 = vpop.permute.xlu0 %2076 }
 0x1f3   : > { %v2292_v22 = vpop.permute.xlu1 %2291  ;;  %v2450_v16 = vmul.f32 %v2077_v10, %v1874_v38 }
 0x1f4   : > { %v2493_v60 = vmul.f32 %v2292_v22, %v1917_v11  ;;  %v1881_v11 = vld [vmem:[%s3981_s10 + $0x108] sm:$0xff]  ;;  %v1928_v22 = vld [vmem:[%s3981_s10 + $0x280] sm:$0xff] }
 0x1f5   : > { %2547 = vst.msk [vmem:[%s3993_s13 + $0xd0] sm:$0xff] %vm2520_vm1, %v2450_v16 }
 0x1f6   : > { %2590 = vst.msk [vmem:[%s3993_s13 + $0x228] sm:$0xff] %vm2520_vm1, %v2493_v60 }
 0x1f7   : > { %v2082_v45 = vpop.permute.xlu1 %2081  ;;  %v2317_v9 = vpop.permute.xlu0 %2316 }
 0x1f8   : > { %v2451_v19 = vmul.f32 %v2082_v45, %v1875_v40  ;;  %v2498_v17 = vmul.f32 %v2317_v9, %v1922_v8  ;;  %v1929_v8 = vld [vmem:[%s3981_s10 + $0x288] sm:$0xff] }
 0x1fa   : > { %2548 = vst.msk [vmem:[%s3993_s13 + $0xd8] sm:$0xff] %vm2520_vm1, %v2451_v19  ;;  %2595 = vst.msk [vmem:[%s3993_s13 + $0x250] sm:$0xff] %vm2520_vm1, %v2498_v17  ;;  %v1886_v19 = vld [vmem:[%s3981_s10 + $0x130] sm:$0xff] }
 0x1fb   : > { %v2322_v21 = vpop.permute.xlu1 %2321  ;;  %v2067_v3 = vpop.permute.xlu0 %2066 }
 0x1fc   : > { %v2499_v28 = vmul.f32 %v2322_v21, %v1923_v23  ;;  %v2448_v48 = vmul.f32 %v2067_v3, %v1872_v20  ;;  %v1887_v20 = vld [vmem:[%s3981_s10 + $0x138] sm:$0xff] }
 0x1fe   : > { %2596 = vst.msk [vmem:[%s3993_s13 + $0x258] sm:$0xff] %vm2520_vm1, %v2499_v28  ;;  %2545 = vst.msk [vmem:[%s3993_s13 + $0xc0] sm:$0xff] %vm2520_vm1, %v2448_v48  ;;  %v1934_v28 = vld [vmem:[%s3981_s10 + $0x2b0] sm:$0xff] }
 0x1ff   : > { %v2072_v15 = vpop.permute.xlu1 %2071  ;;  %v2307_v34 = vpop.permute.xlu0 %2306 }
 0x200   : > { %v2449_v53 = vmul.f32 %v2072_v15, %v1873_v25  ;;  %v2496_v2 = vmul.f32 %v2307_v34, %v1920_v58  ;;  %v1935_v15 = vld [vmem:[%s3981_s10 + $0x2b8] sm:$0xff] }
 0x202   : > { %2546 = vst.msk [vmem:[%s3993_s13 + $0xc8] sm:$0xff] %vm2520_vm1, %v2449_v53  ;;  %2593 = vst.msk [vmem:[%s3993_s13 + $0x240] sm:$0xff] %vm2520_vm1, %v2496_v2  ;;  %v1884_v53 = vld [vmem:[%s3981_s10 + $0x120] sm:$0xff] }
 0x203   : > { %v2312_v32 = vpop.permute.xlu1 %2311  ;;  %v2097_v12 = vpop.permute.xlu0 %2096 }
 0x204   : > { %v2497_v41 = vmul.f32 %v2312_v32, %v1921_v61  ;;  %v2454_v46 = vmul.f32 %v2097_v12, %v1878_v29  ;;  %v1885_v32 = vld [vmem:[%s3981_s10 + $0x128] sm:$0xff] }
 0x206   : > { %2594 = vst.msk [vmem:[%s3993_s13 + $0x248] sm:$0xff] %vm2520_vm1, %v2497_v41  ;;  %2551 = vst.msk [vmem:[%s3993_s13 + $0xf0] sm:$0xff] %vm2520_vm1, %v2454_v46  ;;  %v1932_v41 = vld [vmem:[%s3981_s10 + $0x2a0] sm:$0xff] }
 0x207   : > { %v2102_v50 = vpop.permute.xlu1 %2101  ;;  %v2337_v35 = vpop.permute.xlu0 %2336 }
 0x208   : > { %v2455_v13 = vmul.f32 %v2102_v50, %v1879_v44  ;;  %v2502_v63 = vmul.f32 %v2337_v35, %v1926_v33  ;;  %v1933_v50 = vld [vmem:[%s3981_s10 + $0x2a8] sm:$0xff] }
 0x20a   : > { %2552 = vst.msk [vmem:[%s3993_s13 + $0xf8] sm:$0xff] %vm2520_vm1, %v2455_v13  ;;  %2599 = vst.msk [vmem:[%s3993_s13 + $0x270] sm:$0xff] %vm2520_vm1, %v2502_v63  ;;  %v1890_v13 = vld [vmem:[%s3981_s10 + $0x150] sm:$0xff] }
 0x20b   : > { %v2342_v43 = vpop.permute.xlu1 %2341  ;;  %v2087_v37 = vpop.permute.xlu0 %2086 }
 0x20c   : > { %v2503_v7 = vmul.f32 %v2342_v43, %v1927_v31  ;;  %v2452_v27 = vmul.f32 %v2087_v37, %v1876_v24  ;;  %v1891_v43 = vld [vmem:[%s3981_s10 + $0x158] sm:$0xff] }
 0x20e   : > { %2600 = vst.msk [vmem:[%s3993_s13 + $0x278] sm:$0xff] %vm2520_vm1, %v2503_v7  ;;  %2549 = vst.msk [vmem:[%s3993_s13 + $0xe0] sm:$0xff] %vm2520_vm1, %v2452_v27  ;;  %v1938_v7 = vld [vmem:[%s3981_s10 + $0x2d0] sm:$0xff] }
 0x20f   : > { %v2092_v57 = vpop.permute.xlu1 %2091  ;;  %v2327_v26 = vpop.permute.xlu0 %2326 }
 0x210   : > { %v2453_v36 = vmul.f32 %v2092_v57, %v1877_v59  ;;  %v2500_v42 = vmul.f32 %v2327_v26, %v1924_v62  ;;  %v1939_v57 = vld [vmem:[%s3981_s10 + $0x2d8] sm:$0xff] }
 0x212   : > { %2550 = vst.msk [vmem:[%s3993_s13 + $0xe8] sm:$0xff] %vm2520_vm1, %v2453_v36  ;;  %2597 = vst.msk [vmem:[%s3993_s13 + $0x260] sm:$0xff] %vm2520_vm1, %v2500_v42  ;;  %v1888_v36 = vld [vmem:[%s3981_s10 + $0x140] sm:$0xff] }
 0x213   : > { %v2332_v18 = vpop.permute.xlu1 %2331  ;;  %v2117_v54 = vpop.permute.xlu0 %2116 }
 0x214   : > { %v2501_v39 = vmul.f32 %v2332_v18, %v1925_v56  ;;  %v2458_v55 = vmul.f32 %v2117_v54, %v1882_v47  ;;  %v1889_v18 = vld [vmem:[%s3981_s10 + $0x148] sm:$0xff] }
 0x216   : > { %2598 = vst.msk [vmem:[%s3993_s13 + $0x268] sm:$0xff] %vm2520_vm1, %v2501_v39  ;;  %2555 = vst.msk [vmem:[%s3993_s13 + $0x110] sm:$0xff] %vm2520_vm1, %v2458_v55  ;;  %v1936_v39 = vld [vmem:[%s3981_s10 + $0x2c0] sm:$0xff] }
 0x217   : > { %v2122_v14 = vpop.permute.xlu1 %2121  ;;  %v2357_v51 = vpop.permute.xlu0 %2356 }
 0x218   : > { %v2459_v1 = vmul.f32 %v2122_v14, %v1883_v5  ;;  %v2506_v30 = vmul.f32 %v2357_v51, %v1930_v52  ;;  %v1937_v14 = vld [vmem:[%s3981_s10 + $0x2c8] sm:$0xff] }
 0x21a   : > { %2556 = vst.msk [vmem:[%s3993_s13 + $0x118] sm:$0xff] %vm2520_vm1, %v2459_v1  ;;  %2603 = vst.msk [vmem:[%s3993_s13 + $0x290] sm:$0xff] %vm2520_vm1, %v2506_v30  ;;  %v1894_v1 = vld [vmem:[%s3981_s10 + $0x170] sm:$0xff] }
 0x21b   : > { %v2362_v0 = vpop.permute.xlu1 %2361  ;;  %v2107_v38 = vpop.permute.xlu0 %2106 }
 0x21c   : > { %v2507_v4 = vmul.f32 %v2362_v0, %v1931_v6  ;;  %v2456_v10 = vmul.f32 %v2107_v38, %v1880_v49  ;;  %v1895_v0 = vld [vmem:[%s3981_s10 + $0x178] sm:$0xff] }
 0x21e   : > { %2604 = vst.msk [vmem:[%s3993_s13 + $0x298] sm:$0xff] %vm2520_vm1, %v2507_v4  ;;  %2553 = vst.msk [vmem:[%s3993_s13 + $0x100] sm:$0xff] %vm2520_vm1, %v2456_v10  ;;  %v1892_v4 = vld [vmem:[%s3981_s10 + $0x160] sm:$0xff] }
 0x21f   : > { %v2112_v16 = vpop.permute.xlu1 %2111  ;;  %v2347_v40 = vpop.permute.xlu0 %2346 }
 0x220   : > { %v2457_v60 = vmul.f32 %v2112_v16, %v1881_v11  ;;  %v2504_v45 = vmul.f32 %v2347_v40, %v1928_v22  ;;  %v1893_v16 = vld [vmem:[%s3981_s10 + $0x168] sm:$0xff] }
 0x222   : > { %2554 = vst.msk [vmem:[%s3993_s13 + $0x108] sm:$0xff] %vm2520_vm1, %v2457_v60  ;;  %2601 = vst.msk [vmem:[%s3993_s13 + $0x280] sm:$0xff] %vm2520_vm1, %v2504_v45  ;;  %v1940_v60 = vld [vmem:[%s3981_s10 + $0x2e0] sm:$0xff] }
 0x223   : > { %v2352_v9 = vpop.permute.xlu1 %2351  ;;  %v2137_v17 = vpop.permute.xlu0 %2136 }
 0x224   : > { %v2505_v23 = vmul.f32 %v2352_v9, %v1929_v8  ;;  %v2462_v21 = vmul.f32 %v2137_v17, %v1886_v19  ;;  %v1941_v9 = vld [vmem:[%s3981_s10 + $0x2e8] sm:$0xff] }
 0x226   : > { %2602 = vst.msk [vmem:[%s3993_s13 + $0x288] sm:$0xff] %vm2520_vm1, %v2505_v23  ;;  %2559 = vst.msk [vmem:[%s3993_s13 + $0x130] sm:$0xff] %vm2520_vm1, %v2462_v21  ;;  %v1942_v23 = vld [vmem:[%s3981_s10 + $0x2f0] sm:$0xff] }
 0x227   : > { %v2142_v3 = vpop.permute.xlu1 %2141  ;;  %v2377_v48 = vpop.permute.xlu0 %2376 }
 0x228   : > { %v2463_v25 = vmul.f32 %v2142_v3, %v1887_v20  ;;  %v2510_v58 = vmul.f32 %v2377_v48, %v1934_v28  ;;  %v1943_v3 = vld [vmem:[%s3981_s10 + $0x2f8] sm:$0xff] }
 0x22a   : > { %2560 = vst.msk [vmem:[%s3993_s13 + $0x138] sm:$0xff] %vm2520_vm1, %v2463_v25  ;;  %2607 = vst.msk [vmem:[%s3993_s13 + $0x2b0] sm:$0xff] %vm2520_vm1, %v2510_v58 }
 0x22b   : > { %v2382_v34 = vpop.permute.xlu1 %2381  ;;  %v2127_v61 = vpop.permute.xlu0 %2126 }
 0x22c   : > { %v2511_v2 = vmul.f32 %v2382_v34, %v1935_v15  ;;  %v2460_v29 = vmul.f32 %v2127_v61, %v1884_v53 }
 0x22e   : > { %2608 = vst.msk [vmem:[%s3993_s13 + $0x2b8] sm:$0xff] %vm2520_vm1, %v2511_v2  ;;  %2557 = vst.msk [vmem:[%s3993_s13 + $0x120] sm:$0xff] %vm2520_vm1, %v2460_v29 }
 0x22f   : > { %v2132_v12 = vpop.permute.xlu1 %2131  ;;  %v2367_v44 = vpop.permute.xlu0 %2366 }
 0x230   : > { %v2461_v46 = vmul.f32 %v2132_v12, %v1885_v32  ;;  %v2508_v33 = vmul.f32 %v2367_v44, %v1932_v41 }
 0x232   : > { %2558 = vst.msk [vmem:[%s3993_s13 + $0x128] sm:$0xff] %vm2520_vm1, %v2461_v46  ;;  %2605 = vst.msk [vmem:[%s3993_s13 + $0x2a0] sm:$0xff] %vm2520_vm1, %v2508_v33 }
 0x233   : > { %v2372_v35 = vpop.permute.xlu1 %2371  ;;  %v2157_v31 = vpop.permute.xlu0 %2156 }
 0x234   : > { %v2509_v63 = vmul.f32 %v2372_v35, %v1933_v50  ;;  %v2466_v24 = vmul.f32 %v2157_v31, %v1890_v13 }
 0x236   : > { %2606 = vst.msk [vmem:[%s3993_s13 + $0x2a8] sm:$0xff] %vm2520_vm1, %v2509_v63  ;;  %2563 = vst.msk [vmem:[%s3993_s13 + $0x150] sm:$0xff] %vm2520_vm1, %v2466_v24 }
 0x237   : > { %v2162_v37 = vpop.permute.xlu1 %2161  ;;  %v2397_v59 = vpop.permute.xlu0 %2396 }
 0x238   : > { %v2467_v27 = vmul.f32 %v2162_v37, %v1891_v43  ;;  %v2514_v62 = vmul.f32 %v2397_v59, %v1938_v7 }
 0x23a   : > { %2564 = vst.msk [vmem:[%s3993_s13 + $0x158] sm:$0xff] %vm2520_vm1, %v2467_v27  ;;  %2611 = vst.msk [vmem:[%s3993_s13 + $0x2d0] sm:$0xff] %vm2520_vm1, %v2514_v62 }
 0x23b   : > { %v2402_v26 = vpop.permute.xlu1 %2401  ;;  %v2147_v56 = vpop.permute.xlu0 %2146 }
 0x23c   : > { %v2515_v42 = vmul.f32 %v2402_v26, %v1939_v57  ;;  %v2464_v47 = vmul.f32 %v2147_v56, %v1888_v36 }
 0x23e   : > { %2612 = vst.msk [vmem:[%s3993_s13 + $0x2d8] sm:$0xff] %vm2520_vm1, %v2515_v42  ;;  %2561 = vst.msk [vmem:[%s3993_s13 + $0x140] sm:$0xff] %vm2520_vm1, %v2464_v47 }
 0x23f   : > { %v2152_v54 = vpop.permute.xlu1 %2151  ;;  %v2387_v5 = vpop.permute.xlu0 %2386 }
 0x240   : > { %v2465_v55 = vmul.f32 %v2152_v54, %v1889_v18  ;;  %v2512_v52 = vmul.f32 %v2387_v5, %v1936_v39 }
 0x242   : > { %2562 = vst.msk [vmem:[%s3993_s13 + $0x148] sm:$0xff] %vm2520_vm1, %v2465_v55  ;;  %2609 = vst.msk [vmem:[%s3993_s13 + $0x2c0] sm:$0xff] %vm2520_vm1, %v2512_v52 }
 0x243   : > { %v2392_v51 = vpop.permute.xlu1 %2391  ;;  %v2177_v6 = vpop.permute.xlu0 %2176 }
 0x244   : > { %v2513_v30 = vmul.f32 %v2392_v51, %v1937_v14  ;;  %v2470_v49 = vmul.f32 %v2177_v6, %v1894_v1 }
 0x246   : > { %2610 = vst.msk [vmem:[%s3993_s13 + $0x2c8] sm:$0xff] %vm2520_vm1, %v2513_v30  ;;  %2567 = vst.msk [vmem:[%s3993_s13 + $0x170] sm:$0xff] %vm2520_vm1, %v2470_v49 }
 0x247   : > { %v2182_v38 = vpop.permute.xlu1 %2181  ;;  %v2167_v11 = vpop.permute.xlu0 %2166 }
 0x248   : > { %v2471_v10 = vmul.f32 %v2182_v38, %v1895_v0  ;;  %v2468_v22 = vmul.f32 %v2167_v11, %v1892_v4 }
 0x24a   : > { %2568 = vst.msk [vmem:[%s3993_s13 + $0x178] sm:$0xff] %vm2520_vm1, %v2471_v10  ;;  %2565 = vst.msk [vmem:[%s3993_s13 + $0x160] sm:$0xff] %vm2520_vm1, %v2468_v22 }
 0x24b   : > { %v2172_v40 = vpop.permute.xlu1 %2171  ;;  %v2407_v8 = vpop.permute.xlu0 %2406 }
 0x24c   : > { %v2469_v45 = vmul.f32 %v2172_v40, %v1893_v16  ;;  %v2516_v19 = vmul.f32 %v2407_v8, %v1940_v60 }
 0x24e   : > { %2566 = vst.msk [vmem:[%s3993_s13 + $0x168] sm:$0xff] %vm2520_vm1, %v2469_v45  ;;  %2613 = vst.msk [vmem:[%s3993_s13 + $0x2e0] sm:$0xff] %vm2520_vm1, %v2516_v19 }
 0x24f   : > { %v2412_v17 = vpop.permute.xlu1 %2411  ;;  %v2417_v20 = vpop.permute.xlu0 %2416 }
 0x250   : > { %v2517_v21 = vmul.f32 %v2412_v17, %v1941_v9  ;;  %v2518_v28 = vmul.f32 %v2417_v20, %v1942_v23 }
 0x252   : > { %2614 = vst.msk [vmem:[%s3993_s13 + $0x2e8] sm:$0xff] %vm2520_vm1, %v2517_v21  ;;  %2615 = vst.msk [vmem:[%s3993_s13 + $0x2f0] sm:$0xff] %vm2520_vm1, %v2518_v28 }
 0x253   : > { %v2422_v25 = vpop.permute.xlu1 %2421 }
 0x254   : > { %v2519_v48 = vmul.f32 %v2422_v25, %v1943_v3 }
 0x256   : > { %2616 = vst.msk [vmem:[%s3993_s13 + $0x2f8] sm:$0xff] %vm2520_vm1, %v2519_v48 }
 0x257 PF: > { %s14_s15 = sadd.s32 1, %s3521_s15  }
 0x258   : > { %p11_p4 = scmp.ge.s32.totalorder %s14_s15, 4  }
 0x25a   :  { %13 = sbr.rel (!%p11_p4) target bundleno = 1 (0x1), region = 72 }

</bundles_post_ra>
